<compile_context>
chip_gen: v6e
topology: v6e:2x2x1
jax: 0.10.0
libtpu: 0.0.40
codegen_flags: <defaults>
</compile_context>

<pallas_src>
import functools

import jax
import jax.numpy as jnp
from jax.experimental import pallas as pl
from jax.experimental.pallas import tpu as pltpu


LANE = 128


def _round_up(x, m):
    return ((x + m - 1) // m) * m


# ----------------------------- Pallas kernel ------------------------------- #

def _conv_block_kernel(*refs, stride, relu, res_mode, wph):
    """Fused 3x3 conv + folded BN (+ residual / projection) (+ ReLU), 1 image.

    refs (res_mode == "none"): x_ref, w_ref, b_ref, o_ref
    refs (res_mode == "add") : x_ref, w_ref, b_ref, res_ref, o_ref
    refs (res_mode == "proj"): x_ref, w_ref, b_ref, rx_ref, rw_ref, o_ref

    x_ref : (s*s, Lp, Cin) bf16  flattened spatial phases of the padded image
    w_ref : (9, Cin, Cp)   bf16  per-tap weights, BN scale folded in
    b_ref : (1, Cp)        f32   folded BN bias (shortcut bias pre-summed)
    res_ref:(Lo, Cp)       bf16  identity-shortcut residual (on output row grid)
    rx_ref: (Lo, Cr)       bf16  strided input for the 1x1 projection shortcut
    rw_ref: (Cr, Cp)       bf16  1x1 shortcut weights, BN scale folded in
    o_ref : (Lo, Cp)             output on the (Ho, Wph) row grid
    """
    if res_mode == "proj":
        x_ref, w_ref, b_ref, rx_ref, rw_ref, o_ref = refs
    elif res_mode == "add":
        x_ref, w_ref, b_ref, res_ref, o_ref = refs
    else:
        x_ref, w_ref, b_ref, o_ref = refs

    lo, cp = o_ref.shape

    # 9-tap accumulation: each tap is a contiguous row window of one phase.
    acc = jnp.zeros((lo, cp), jnp.float32)
    for kh in range(3):
        for kw in range(3):
            phase = (kh % stride) * stride + (kw % stride)
            start = (kh // stride) * wph + (kw // stride)      # static offsets
            a = x_ref[phase, start:start + lo, :]              # (Lo, Cin) bf16
            acc = acc + jnp.dot(a, w_ref[kh * 3 + kw],
                                preferred_element_type=jnp.float32)

    y = acc + b_ref[...]                                       # folded BN bias
    if res_mode == "proj":                                     # fused 1x1 + BN
        y = y + jnp.dot(rx_ref[...], rw_ref[...],
                        preferred_element_type=jnp.float32)
    elif res_mode == "add":                                    # identity skip
        y = y + res_ref[...].astype(jnp.float32)
    if relu:
        y = jnp.maximum(y, 0.0)
    o_ref[...] = y.astype(o_ref.dtype)


# ------------------------------- Glue (JAX) -------------------------------- #

def _conv_phases(x_nhwc, stride):
    """Flattened per-stride-phase views of the spatially padded NHWC image.

    Returns (phases, Ho, Wo, Wph) with phases: (N, s*s, Lp, C) bf16 where
    Lp = (Ho + 2//s) * Wph + 2//s, so every conv tap is a contiguous window.
    """
    N, H, W, C = x_nhwc.shape
    s = stride
    Ho = (H + 2 - 3) // s + 1
    Wo = (W + 2 - 3) // s + 1
    Hph, Wph = Ho + 2 // s, Wo + 2 // s
    xp = jnp.pad(x_nhwc, ((0, 0), (1, 1), (1, 1), (0, 0)))
    phs = []
    for p in range(s):
        for q in range(s):
            ph = xp[:, p::s, q::s, :][:, :Hph, :Wph, :]
            ph = jnp.pad(ph, ((0, 0), (0, Hph - ph.shape[1]),
                              (0, Wph - ph.shape[2]), (0, 0)))
            phs.append(ph)
    phases = jnp.stack(phs, axis=1).reshape(N, s * s, Hph * Wph, C)
    phases = jnp.pad(phases, ((0, 0), (0, 0), (0, 2 // s), (0, 0)))
    return phases.astype(jnp.bfloat16), Ho, Wo, Wph


def _conv3x3_bn(x_nhwc, w9, bias, *, stride, relu, residual=None, proj=None,
                out_dtype=jnp.bfloat16):
    """One fused pallas_call: conv3x3 + BN (+ residual / 1x1 shortcut) (+ ReLU)."""
    phases, Ho, Wo, Wph = _conv_phases(x_nhwc, stride)
    N, SS, Lp, Cin = phases.shape
    Cp = w9.shape[-1]
    Lo = Ho * Wph
    bias2 = bias.reshape(1, Cp).astype(jnp.float32)

    in_specs = [
        pl.BlockSpec((None, SS, Lp, Cin), lambda n: (n, 0, 0, 0)),   # phases
        pl.BlockSpec((9, Cin, Cp), lambda n: (0, 0, 0)),             # weights
        pl.BlockSpec((1, Cp), lambda n: (0, 0)),                     # bias
    ]
    args = [phases, w9, bias2]

    def _to_row_grid(r):   # (N, Ho, Wo, C*) -> (N, Lo, C*) on the (Ho, Wph) grid
        r = jnp.pad(r, ((0, 0), (0, 0), (0, Wph - Wo), (0, 0)))
        return r.reshape(N, Lo, r.shape[-1]).astype(jnp.bfloat16)

    if proj is not None:
        rx, rw = proj
        rx = _to_row_grid(rx)
        in_specs += [pl.BlockSpec((None, Lo, rx.shape[-1]), lambda n: (n, 0, 0)),
                     pl.BlockSpec(rw.shape, lambda n: (0, 0))]
        args += [rx, rw.astype(jnp.bfloat16)]
        res_mode = "proj"
    elif residual is not None:
        res = _to_row_grid(residual)
        in_specs.append(pl.BlockSpec((None, Lo, Cp), lambda n: (n, 0, 0)))
        args.append(res)
        res_mode = "add"
    else:
        res_mode = "none"

    kernel = functools.partial(_conv_block_kernel, stride=stride, relu=relu,
                               res_mode=res_mode, wph=Wph)
    out = pl.pallas_call(
        kernel,
        out_shape=jax.ShapeDtypeStruct((N, Lo, Cp), out_dtype),
        grid=(N,),
        in_specs=in_specs,
        out_specs=pl.BlockSpec((None, Lo, Cp), lambda n: (n, 0, 0)),
        compiler_params=pltpu.CompilerParams(
            dimension_semantics=("parallel",),
            vmem_limit_bytes=32 * 1024 * 1024),
    )(*args)
    # Drop the Wph "wrap-around" junk columns -> (N, Ho, Wo, Cp).
    return out.reshape(N, Ho, Wph, Cp)[:, :, :Wo, :]


def _fold_bn(gamma, beta, mean, var, eps=1e-5):
    scale = gamma / jnp.sqrt(var + eps)
    return scale, beta - mean * scale


def _conv3x3_weights(w, scale, cin_pad, cout_pad):
    # torch (Cout, Cin, 3, 3) -> (9, cin_pad, cout_pad) bf16, BN scale folded.
    cout, cin = w.shape[0], w.shape[1]
    wm = jnp.transpose(w, (2, 3, 1, 0)).reshape(9, cin, cout)
    wm = wm * scale.reshape(1, 1, cout)
    wm = jnp.pad(wm, ((0, 0), (0, cin_pad - cin), (0, cout_pad - cout)))
    return wm.astype(jnp.bfloat16)


def _conv1x1_weights(w, scale, cout_pad):
    # torch (Cout, Cin, 1, 1) -> (Cin, cout_pad) bf16, BN scale folded.
    cout, cin = w.shape[0], w.shape[1]
    wm = jnp.transpose(w, (2, 3, 1, 0)).reshape(cin, cout) * scale.reshape(1, cout)
    return jnp.pad(wm, ((0, 0), (0, cout_pad - cout))).astype(jnp.bfloat16)


def basic_block_forward(x_nchw, params, stride=1):
    """BasicBlock.forward: relu(bn2(conv2(relu(bn1(conv1(x))))) + shortcut(x))."""
    N, Cin, H, W = x_nchw.shape
    planes = params["conv1_w"].shape[0]
    cp = _round_up(planes, LANE)            # lane-dense output channels

    x_nhwc = jnp.transpose(x_nchw, (0, 2, 3, 1))

    # conv1 (3x3, stride) + bn1 + relu -- one fused pallas_call, bf16 output
    s1, b1 = _fold_bn(params["bn1_gamma"], params["bn1_beta"],
                      params["bn1_mean"], params["bn1_var"])
    w1 = _conv3x3_weights(params["conv1_w"], s1, Cin, cp)
    b1 = jnp.pad(b1, (0, cp - planes))
    out1 = _conv3x3_bn(x_nhwc, w1, b1, stride=stride, relu=True,
                       out_dtype=jnp.bfloat16)          # (N, Ho, Wo, cp)

    # conv2 (3x3, stride 1) + bn2 + shortcut + relu -- one fused pallas_call
    s2, b2 = _fold_bn(params["bn2_gamma"], params["bn2_beta"],
                      params["bn2_mean"], params["bn2_var"])
    w2 = _conv3x3_weights(params["conv2_w"], s2, cp, cp)   # Cin padded to cp
    b2 = jnp.pad(b2, (0, cp - planes))

    if stride != 1 or Cin != planes:
        # Projection shortcut: 1x1 conv + BN, fused into the conv2 kernel.
        ss, bs = _fold_bn(params["sc_gamma"], params["sc_beta"],
                          params["sc_mean"], params["sc_var"])
        rw = _conv1x1_weights(params["sc_w"], ss, cp)
        rx = x_nhwc[:, ::stride, ::stride, :]               # (N, Ho, Wo, Cin)
        bias = b2 + jnp.pad(bs, (0, cp - planes))
        out = _conv3x3_bn(out1, w2, bias, stride=1, relu=True,
                          proj=(rx, rw), out_dtype=jnp.float32)
    else:
        # Identity shortcut: x itself, lane-padded, streamed in bf16.
        res = jnp.pad(x_nhwc, ((0, 0), (0, 0), (0, 0), (0, cp - Cin)))
        out = _conv3x3_bn(out1, w2, b2, stride=1, relu=True,
                          residual=res, out_dtype=jnp.float32)

    out = out[..., :planes]                                 # drop lane padding
    return jnp.transpose(out, (0, 3, 1, 2))                 # back to NCHW


# --------------------------- pure-JAX reference ----------------------------- #

def _reference_forward(x, p, stride):
    def conv(x, w, s, pad):
        return jax.lax.conv_general_dilated(
            x, w, (s, s), pad, dimension_numbers=("NCHW", "OIHW", "NCHW"))

    def bn(x, g, b, m, v, eps=1e-5):
        sh = (1, -1, 1, 1)
        return (x - m.reshape(sh)) / jnp.sqrt(v.reshape(sh) + eps) \
            * g.reshape(sh) + b.reshape(sh)

    out = jax.nn.relu(bn(conv(x, p["conv1_w"], stride, [(1, 1), (1, 1)]),
                         p["bn1_gamma"], p["bn1_beta"],
                         p["bn1_mean"], p["bn1_var"]))
    out = bn(conv(out, p["conv2_w"], 1, [(1, 1), (1, 1)]),
             p["bn2_gamma"], p["bn2_beta"], p["bn2_mean"], p["bn2_var"])
    if stride != 1 or x.shape[1] != p["conv1_w"].shape[0]:
        sc = bn(conv(x, p["sc_w"], stride, [(0, 0), (0, 0)]),
                p["sc_gamma"], p["sc_beta"], p["sc_mean"], p["sc_var"])
    else:
        sc = x
    return jax.nn.relu(out + sc)


# ------------------------- deterministic init ------------------------------ #

def init_basic_block_params(key, in_planes, planes, stride=1):
    ks = jax.random.split(key, 8)
    params = {
        "conv1_w": 0.1 * jax.random.normal(ks[0], (planes, in_planes, 3, 3),
                                           jnp.float32),
        "bn1_gamma": 1.0 + 0.05 * jax.random.normal(ks[1], (planes,), jnp.float32),
        "bn1_beta": 0.05 * jax.random.normal(ks[2], (planes,), jnp.float32),
        "bn1_mean": 0.05 * jax.random.normal(ks[3], (planes,), jnp.float32),
        "bn1_var": 1.0 + 0.1 * jnp.abs(jax.random.normal(ks[4], (planes,),
                                                         jnp.float32)),
        "conv2_w": 0.1 * jax.random.normal(ks[5], (planes, planes, 3, 3),
                                           jnp.float32),
        "bn2_gamma": 1.0 + 0.05 * jax.random.normal(ks[6], (planes,), jnp.float32),
        "bn2_beta": 0.05 * jax.random.normal(ks[7], (planes,), jnp.float32),
        "bn2_mean": jnp.zeros((planes,), jnp.float32),
        "bn2_var": jnp.ones((planes,), jnp.float32),
    }
    if stride != 1 or in_planes != planes:
        ks2 = jax.random.split(ks[0], 3)
        params.update({
            "sc_w": 0.1 * jax.random.normal(ks2[0], (planes, in_planes, 1, 1),
                                            jnp.float32),
            "sc_gamma": 1.0 + 0.05 * jax.random.normal(ks2[1], (planes,),
                                                       jnp.float32),
            "sc_beta": 0.05 * jax.random.normal(ks2[2], (planes,), jnp.float32),
            "sc_mean": jnp.zeros((planes,), jnp.float32),
            "sc_var": jnp.ones((planes,), jnp.float32),
        })
    return params


# ---------------------------------- main ----------------------------------- #

if __name__ == "__main__":
    key = jax.random.PRNGKey(0)
    k_x, k_p1, k_p2 = jax.random.split(key, 3)

    x = jax.random.normal(k_x, (2, 4, 16, 16), jnp.float32)     # NCHW

    # Case 1: identity shortcut (stride=1, in_planes == planes)
    p1 = init_basic_block_params(k_p1, in_planes=4, planes=4, stride=1)
    y1 = jax.block_until_ready(basic_block_forward(x, p1, stride=1))
    assert y1.shape == (2, 4, 16, 16)
    err1 = float(jnp.max(jnp.abs(y1 - _reference_forward(x, p1, 1))))
    assert err1 < 0.1, f"case1 max abs err {err1}"

    # Case 2: projection shortcut (stride=2, channel expansion 4 -> 8)
    p2 = init_basic_block_params(k_p2, in_planes=4, planes=8, stride=2)
    y2 = jax.block_until_ready(basic_block_forward(x, p2, stride=2))
    assert y2.shape == (2, 8, 8, 8)
    err2 = float(jnp.max(jnp.abs(y2 - _reference_forward(x, p2, 2))))
    assert err2 < 0.1, f"case2 max abs err {err2}"

    print("KERNEL_OK")
</pallas_src>

<mosaic_0001>
module attributes {stable_mosaic.version = 11 : i64} {
  func.func @_conv_block_kernel(%arg0: i32, %arg1: memref<1x1x326x4xbf16, #tpu.memory_space<vmem>>, %arg2: memref<9x4x128xbf16, #tpu.memory_space<vmem>>, %arg3: memref<1x128xf32, #tpu.memory_space<vmem>>, %arg4: memref<1x288x128xbf16, #tpu.memory_space<vmem>>) attributes {dimension_semantics = [#tpu.dimension_semantics<parallel>], iteration_bounds = array<i64: 2>, scalar_prefetch = 0 : i64, scratch_operands = 0 : i64, tpu.core_type = #tpu.core_type<tc>, window_params = [{transform_indices = @transform_0, window_bounds = array<i64: 1, 1, 326, 4>}, {pipeline_mode = #tpu.pipeline_mode<synchronous>, transform_indices = @transform_1, window_bounds = array<i64: 9, 4, 128>}, {pipeline_mode = #tpu.pipeline_mode<synchronous>, transform_indices = @transform_2, window_bounds = array<i64: 1, 128>}, {transform_indices = @transform_3, window_bounds = array<i64: 1, 288, 128>}]} {
    %cst = arith.constant 0.000000e+00 : f32
    %0 = vector.broadcast %cst : f32 to vector<288x128xf32>
    %c0 = arith.constant 0 : index
    %c0_0 = arith.constant 0 : index
    %c0_1 = arith.constant 0 : index
    %c0_2 = arith.constant 0 : index
    %1 = vector.load %arg1[%c0, %c0_0, %c0_1, %c0_2] : memref<1x1x326x4xbf16, #tpu.memory_space<vmem>>, vector<1x1x288x4xbf16>
    %2 = vector.shape_cast %1 : vector<1x1x288x4xbf16> to vector<288x4xbf16>
    %c0_3 = arith.constant 0 : index
    %c0_4 = arith.constant 0 : index
    %c0_5 = arith.constant 0 : index
    %3 = vector.load %arg2[%c0_3, %c0_4, %c0_5] : memref<9x4x128xbf16, #tpu.memory_space<vmem>>, vector<1x4x128xbf16>
    %4 = vector.shape_cast %3 : vector<1x4x128xbf16> to vector<4x128xbf16>
    %cst_6 = arith.constant dense<0.000000e+00> : vector<288x128xf32>
    %5 = tpu.matmul %2, %4, %cst_6 {dimension_numbers = #tpu.dot_dimension_numbers<[1], [0], [0], [1], [0, 0, 1, 1], [], []>} : vector<288x4xbf16>, vector<4x128xbf16>, vector<288x128xf32> -> vector<288x128xf32>
    %6 = arith.addf %0, %5 : vector<288x128xf32>
    %c0_7 = arith.constant 0 : index
    %c0_8 = arith.constant 0 : index
    %c1 = arith.constant 1 : index
    %c0_9 = arith.constant 0 : index
    %7 = vector.load %arg1[%c0_7, %c0_8, %c1, %c0_9] : memref<1x1x326x4xbf16, #tpu.memory_space<vmem>>, vector<1x1x288x4xbf16>
    %8 = vector.shape_cast %7 : vector<1x1x288x4xbf16> to vector<288x4xbf16>
    %c1_10 = arith.constant 1 : index
    %c0_11 = arith.constant 0 : index
    %c0_12 = arith.constant 0 : index
    %9 = vector.load %arg2[%c1_10, %c0_11, %c0_12] : memref<9x4x128xbf16, #tpu.memory_space<vmem>>, vector<1x4x128xbf16>
    %10 = vector.shape_cast %9 : vector<1x4x128xbf16> to vector<4x128xbf16>
    %cst_13 = arith.constant dense<0.000000e+00> : vector<288x128xf32>
    %11 = tpu.matmul %8, %10, %cst_13 {dimension_numbers = #tpu.dot_dimension_numbers<[1], [0], [0], [1], [0, 0, 1, 1], [], []>} : vector<288x4xbf16>, vector<4x128xbf16>, vector<288x128xf32> -> vector<288x128xf32>
    %12 = arith.addf %6, %11 : vector<288x128xf32>
    %c0_14 = arith.constant 0 : index
    %c0_15 = arith.constant 0 : index
    %c2 = arith.constant 2 : index
    %c0_16 = arith.constant 0 : index
    %13 = vector.load %arg1[%c0_14, %c0_15, %c2, %c0_16] : memref<1x1x326x4xbf16, #tpu.memory_space<vmem>>, vector<1x1x288x4xbf16>
    %14 = vector.shape_cast %13 : vector<1x1x288x4xbf16> to vector<288x4xbf16>
    %c2_17 = arith.constant 2 : index
    %c0_18 = arith.constant 0 : index
    %c0_19 = arith.constant 0 : index
    %15 = vector.load %arg2[%c2_17, %c0_18, %c0_19] : memref<9x4x128xbf16, #tpu.memory_space<vmem>>, vector<1x4x128xbf16>
    %16 = vector.shape_cast %15 : vector<1x4x128xbf16> to vector<4x128xbf16>
    %cst_20 = arith.constant dense<0.000000e+00> : vector<288x128xf32>
    %17 = tpu.matmul %14, %16, %cst_20 {dimension_numbers = #tpu.dot_dimension_numbers<[1], [0], [0], [1], [0, 0, 1, 1], [], []>} : vector<288x4xbf16>, vector<4x128xbf16>, vector<288x128xf32> -> vector<288x128xf32>
    %18 = arith.addf %12, %17 : vector<288x128xf32>
    %c0_21 = arith.constant 0 : index
    %c0_22 = arith.constant 0 : index
    %c18 = arith.constant 18 : index
    %c0_23 = arith.constant 0 : index
    %19 = vector.load %arg1[%c0_21, %c0_22, %c18, %c0_23] : memref<1x1x326x4xbf16, #tpu.memory_space<vmem>>, vector<1x1x288x4xbf16>
    %20 = vector.shape_cast %19 : vector<1x1x288x4xbf16> to vector<288x4xbf16>
    %c3 = arith.constant 3 : index
    %c0_24 = arith.constant 0 : index
    %c0_25 = arith.constant 0 : index
    %21 = vector.load %arg2[%c3, %c0_24, %c0_25] : memref<9x4x128xbf16, #tpu.memory_space<vmem>>, vector<1x4x128xbf16>
    %22 = vector.shape_cast %21 : vector<1x4x128xbf16> to vector<4x128xbf16>
    %cst_26 = arith.constant dense<0.000000e+00> : vector<288x128xf32>
    %23 = tpu.matmul %20, %22, %cst_26 {dimension_numbers = #tpu.dot_dimension_numbers<[1], [0], [0], [1], [0, 0, 1, 1], [], []>} : vector<288x4xbf16>, vector<4x128xbf16>, vector<288x128xf32> -> vector<288x128xf32>
    %24 = arith.addf %18, %23 : vector<288x128xf32>
    %c0_27 = arith.constant 0 : index
    %c0_28 = arith.constant 0 : index
    %c19 = arith.constant 19 : index
    %c0_29 = arith.constant 0 : index
    %25 = vector.load %arg1[%c0_27, %c0_28, %c19, %c0_29] : memref<1x1x326x4xbf16, #tpu.memory_space<vmem>>, vector<1x1x288x4xbf16>
    %26 = vector.shape_cast %25 : vector<1x1x288x4xbf16> to vector<288x4xbf16>
    %c4 = arith.constant 4 : index
    %c0_30 = arith.constant 0 : index
    %c0_31 = arith.constant 0 : index
    %27 = vector.load %arg2[%c4, %c0_30, %c0_31] : memref<9x4x128xbf16, #tpu.memory_space<vmem>>, vector<1x4x128xbf16>
    %28 = vector.shape_cast %27 : vector<1x4x128xbf16> to vector<4x128xbf16>
    %cst_32 = arith.constant dense<0.000000e+00> : vector<288x128xf32>
    %29 = tpu.matmul %26, %28, %cst_32 {dimension_numbers = #tpu.dot_dimension_numbers<[1], [0], [0], [1], [0, 0, 1, 1], [], []>} : vector<288x4xbf16>, vector<4x128xbf16>, vector<288x128xf32> -> vector<288x128xf32>
    %30 = arith.addf %24, %29 : vector<288x128xf32>
    %c0_33 = arith.constant 0 : index
    %c0_34 = arith.constant 0 : index
    %c20 = arith.constant 20 : index
    %c0_35 = arith.constant 0 : index
    %31 = vector.load %arg1[%c0_33, %c0_34, %c20, %c0_35] : memref<1x1x326x4xbf16, #tpu.memory_space<vmem>>, vector<1x1x288x4xbf16>
    %32 = vector.shape_cast %31 : vector<1x1x288x4xbf16> to vector<288x4xbf16>
    %c5 = arith.constant 5 : index
    %c0_36 = arith.constant 0 : index
    %c0_37 = arith.constant 0 : index
    %33 = vector.load %arg2[%c5, %c0_36, %c0_37] : memref<9x4x128xbf16, #tpu.memory_space<vmem>>, vector<1x4x128xbf16>
    %34 = vector.shape_cast %33 : vector<1x4x128xbf16> to vector<4x128xbf16>
    %cst_38 = arith.constant dense<0.000000e+00> : vector<288x128xf32>
    %35 = tpu.matmul %32, %34, %cst_38 {dimension_numbers = #tpu.dot_dimension_numbers<[1], [0], [0], [1], [0, 0, 1, 1], [], []>} : vector<288x4xbf16>, vector<4x128xbf16>, vector<288x128xf32> -> vector<288x128xf32>
    %36 = arith.addf %30, %35 : vector<288x128xf32>
    %c0_39 = arith.constant 0 : index
    %c0_40 = arith.constant 0 : index
    %c36 = arith.constant 36 : index
    %c0_41 = arith.constant 0 : index
    %37 = vector.load %arg1[%c0_39, %c0_40, %c36, %c0_41] : memref<1x1x326x4xbf16, #tpu.memory_space<vmem>>, vector<1x1x288x4xbf16>
    %38 = vector.shape_cast %37 : vector<1x1x288x4xbf16> to vector<288x4xbf16>
    %c6 = arith.constant 6 : index
    %c0_42 = arith.constant 0 : index
    %c0_43 = arith.constant 0 : index
    %39 = vector.load %arg2[%c6, %c0_42, %c0_43] : memref<9x4x128xbf16, #tpu.memory_space<vmem>>, vector<1x4x128xbf16>
    %40 = vector.shape_cast %39 : vector<1x4x128xbf16> to vector<4x128xbf16>
    %cst_44 = arith.constant dense<0.000000e+00> : vector<288x128xf32>
    %41 = tpu.matmul %38, %40, %cst_44 {dimension_numbers = #tpu.dot_dimension_numbers<[1], [0], [0], [1], [0, 0, 1, 1], [], []>} : vector<288x4xbf16>, vector<4x128xbf16>, vector<288x128xf32> -> vector<288x128xf32>
    %42 = arith.addf %36, %41 : vector<288x128xf32>
    %c0_45 = arith.constant 0 : index
    %c0_46 = arith.constant 0 : index
    %c37 = arith.constant 37 : index
    %c0_47 = arith.constant 0 : index
    %43 = vector.load %arg1[%c0_45, %c0_46, %c37, %c0_47] : memref<1x1x326x4xbf16, #tpu.memory_space<vmem>>, vector<1x1x288x4xbf16>
    %44 = vector.shape_cast %43 : vector<1x1x288x4xbf16> to vector<288x4xbf16>
    %c7 = arith.constant 7 : index
    %c0_48 = arith.constant 0 : index
    %c0_49 = arith.constant 0 : index
    %45 = vector.load %arg2[%c7, %c0_48, %c0_49] : memref<9x4x128xbf16, #tpu.memory_space<vmem>>, vector<1x4x128xbf16>
    %46 = vector.shape_cast %45 : vector<1x4x128xbf16> to vector<4x128xbf16>
    %cst_50 = arith.constant dense<0.000000e+00> : vector<288x128xf32>
    %47 = tpu.matmul %44, %46, %cst_50 {dimension_numbers = #tpu.dot_dimension_numbers<[1], [0], [0], [1], [0, 0, 1, 1], [], []>} : vector<288x4xbf16>, vector<4x128xbf16>, vector<288x128xf32> -> vector<288x128xf32>
    %48 = arith.addf %42, %47 : vector<288x128xf32>
    %c0_51 = arith.constant 0 : index
    %c0_52 = arith.constant 0 : index
    %c38 = arith.constant 38 : index
    %c0_53 = arith.constant 0 : index
    %49 = vector.load %arg1[%c0_51, %c0_52, %c38, %c0_53] : memref<1x1x326x4xbf16, #tpu.memory_space<vmem>>, vector<1x1x288x4xbf16>
    %50 = vector.shape_cast %49 : vector<1x1x288x4xbf16> to vector<288x4xbf16>
    %c8 = arith.constant 8 : index
    %c0_54 = arith.constant 0 : index
    %c0_55 = arith.constant 0 : index
    %51 = vector.load %arg2[%c8, %c0_54, %c0_55] : memref<9x4x128xbf16, #tpu.memory_space<vmem>>, vector<1x4x128xbf16>
    %52 = vector.shape_cast %51 : vector<1x4x128xbf16> to vector<4x128xbf16>
    %cst_56 = arith.constant dense<0.000000e+00> : vector<288x128xf32>
    %53 = tpu.matmul %50, %52, %cst_56 {dimension_numbers = #tpu.dot_dimension_numbers<[1], [0], [0], [1], [0, 0, 1, 1], [], []>} : vector<288x4xbf16>, vector<4x128xbf16>, vector<288x128xf32> -> vector<288x128xf32>
    %54 = arith.addf %48, %53 : vector<288x128xf32>
    %c0_57 = arith.constant 0 : index
    %c0_58 = arith.constant 0 : index
    %55 = vector.load %arg3[%c0_57, %c0_58] : memref<1x128xf32, #tpu.memory_space<vmem>>, vector<1x128xf32>
    %56 = vector.broadcast %55 : vector<1x128xf32> to vector<288x128xf32>
    %57 = arith.addf %54, %56 : vector<288x128xf32>
    %cst_59 = arith.constant 0.000000e+00 : f32
    %58 = vector.broadcast %cst_59 : f32 to vector<288x128xf32>
    %59 = arith.maximumf %57, %58 : vector<288x128xf32>
    %60 = arith.truncf %59 : vector<288x128xf32> to vector<288x128xbf16>
    %c0_60 = arith.constant 0 : index
    %c0_61 = arith.constant 0 : index
    %c0_62 = arith.constant 0 : index
    %61 = vector.load %arg4[%c0_60, %c0_61, %c0_62] : memref<1x288x128xbf16, #tpu.memory_space<vmem>>, vector<1x288x128xbf16>
    %62 = vector.shape_cast %61 : vector<1x288x128xbf16> to vector<288x128xbf16>
    %63 = vector.shape_cast %60 : vector<288x128xbf16> to vector<1x288x128xbf16>
    tpu.vector_store %arg4[%c0_60, %c0_61, %c0_62], %63 {strides = array<i32>} : memref<1x288x128xbf16, #tpu.memory_space<vmem>>, vector<1x288x128xbf16>,
    return
  }
  func.func @transform_0(%arg0: i32) -> (i32, i32, i32, i32) {
    %c0_i32 = arith.constant 0 : i32
    %c0_i32_0 = arith.constant 0 : i32
    %c0_i32_1 = arith.constant 0 : i32
    %c0_i32_2 = arith.constant 0 : i32
    return %arg0, %c0_i32, %c0_i32_0, %c0_i32_1 : i32, i32, i32, i32
  }
  func.func @transform_1(%arg0: i32) -> (i32, i32, i32) {
    %c0_i32 = arith.constant 0 : i32
    %c0_i32_0 = arith.constant 0 : i32
    %c0_i32_1 = arith.constant 0 : i32
    %c0_i32_2 = arith.constant 0 : i32
    return %c0_i32, %c0_i32_0, %c0_i32_1 : i32, i32, i32
  }
  func.func @transform_2(%arg0: i32) -> (i32, i32) {
    %c0_i32 = arith.constant 0 : i32
    %c0_i32_0 = arith.constant 0 : i32
    %c0_i32_1 = arith.constant 0 : i32
    return %c0_i32, %c0_i32_0 : i32, i32
  }
  func.func @transform_3(%arg0: i32) -> (i32, i32, i32) {
    %c0_i32 = arith.constant 0 : i32
    %c0_i32_0 = arith.constant 0 : i32
    %c0_i32_1 = arith.constant 0 : i32
    return %arg0, %c0_i32, %c0_i32_0 : i32, i32, i32
  }
}

</mosaic_0001>

<bundles_post_ra>
// kernel: tpu_custom_call.1
= control target key start
LH: loop header
LB: loop body
LE: loop exit
PB: predicated region body
PF: predicated region fallthrough
CT: control target
= control target key end

     0   :  { %8 = vsyncpa [#allocation3], 0  ;;  %s6545_s0 = inlined_call_operand.vmem [shape: bf16[2,1,326,4], index: 0, kind: input, shape index: {}]   ;;  %s6546_s1 = inlined_call_operand.vmem [shape: bf16[9,4,128], index: 1, kind: input, shape index: {}]   ;;  %s6547_s2 = inlined_call_operand.vmem [shape: f32[1,128], index: 2, kind: input, shape index: {}]   ;;  %s6548_s3 = inlined_call_operand.hbm [shape: bf16[2,288,128], index: 3, kind: output, shape index: {}]  }
   0x1   :  { %10 = vsyncpa [#allocation3 + $0x1], 0  ;;  %s5089_s12 = smov 0   ;;  %s5091_s13 = smov 0  }
   0x2   :  { %s5093_s14 = smov 0   ;;  %s5095_s15 = smov 0  }
   0x3 LB: > { %s5110_s16 = sadd.s32 4294967295, %s5064_s15   ;;  %s3953_s17 = sadd.s32 4294967294, %s5064_s15   ;;  %s5064_s15 = sphi %s5095_s15, %s6592_s15   ;;  %s5060_s14 = sphi %s5093_s14, %s6591_s14   ;;  %s5056_s13 = sphi %s5091_s13, %s6590_s13   ;;  %s5052_s12 = sphi %s5089_s12, %s6589_s12  }
   0x4   : > { %s5114_s18 = sadd.s32 1, %s5064_s15   ;;  %s91_s19 = sadd.s32 1, %s5060_s14 }
   0x5   : > { %s88_s20 = ssub.s32 %s5064_s15, %s5114_s18  ;;  %p101_p0 = scmp.ne.s32.totalorder %s5060_s14, %s5056_s13 }
   0x6   : > { %p89_p1 = scmp.eq.s32.totalorder %s88_s20, 0  ;;  %p102_p2 = scmp.eq.s32.totalorder %s5110_s16, 1 }
   0x7   : > { %p107_p3 = scmp.ne.s32.totalorder %s5056_s13, %s5052_s12  ;;  %p108_p4 = scmp.eq.s32.totalorder %s3953_s17, 1 }
   0x8   : > { %s5125_s21 = scalar_select %p89_p1, %s5060_s14, %s91_s19  }
   0x9   : > { %p5127_p5 = por %p102_p2, %p101_p0  ;;  %p5131_p6 = por %p108_p4, %p107_p3 }
   0xa   : > { %p3956_p7 = scmp.ge.s32.totalorder %s5064_s15, 1  ;;  %p140_p8 = scmp.lt.s32.totalorder %s5064_s15, 3 }
   0xc   : > { %p141_p9 = pnand %p3956_p7, %p140_p8 }
   0xe   : > { %144 = sbr.rel (%p141_p9) target bundleno = 578 (0x242), region = 32 }
  0x13   : > { %v3958_v0 = vld [vmem:[%s6546_s1 + $0x2] sm:$0x3]  ;;  %vm507_vm0 = vcmask 1041408   ;;  %p164_p10 = scmp.lt.s32.totalorder %s5110_s16, 1  ;;  %v4014_v2 = vld [vmem:[%s6546_s1 + $0x4] sm:$0x3] }
  0x14   : > { %4888 = vmatprep.subr.msk.bf16.mxu0 %vm507_vm0, %v3958_v0  ;;  %4889 = vmatprep.subr.msk.bf16.mxu1 %vm507_vm0, %v3958_v0  ;;  %v509_v1 = vsel %vm507_vm0, %v3958_v0, 0  ;;  %v206_v3 = vld [vmem:[%s6546_s1] sm:$0x3]  ;;  %vm303_vm1 = vsmask.f32 7424  ;;  %vm452_vm2 = vcmask 31744  }
  0x15   : > { %4545 = vmatpush3.bf16.msra.mxu0 %v509_v1  ;;  %4887 = vmatpush3.bf16.msra.mxu1 %v509_v1  ;;  %s165_s30 = scalar_select %p164_p10, %s5110_s16, 1  ;;  %v1003_v8 = vsel %vm507_vm0, %v4014_v2, 0  ;;  %v725_v16 = vsel %vm507_vm0, %v206_v3, 0  ;;  %v5201_v33 = vld [vmem:[%s6546_s1 + $0x8] sm:$0x3]  ;;  %vm910_vm3 = vcmask 1046528  }
  0x16   : > { %4891 = vmatprep.subr.msk.bf16.mxu0 %vm507_vm0, %v4014_v2  ;;  %4890 = vmatprep.subr.msk.bf16.mxu1 %vm507_vm0, %v206_v3  ;;  %v5221_v45 = vld [vmem:[%s6546_s1 + $0x6] sm:$0x3]  ;;  %vm2110_vm4 = vcmask 1045504   ;;  %vm1663_vm5 = vsmask.f32 6400  ;;  %vm3310_vm6 = vcmask 1044480  }
  0x17   : > { %s4899_s4 = smul.u32 164, %s165_s30  ;;  %vm2863_vm7 = vsmask.f32 5376  ;;  %s5066_s19 = smov [#allocation2]  }
  0x18   : > { %s5008_s20 = sshll.u32 %s5066_s19, 4  ;;  %s5009_s20 = int_to_ptr.vmem [resolvable:$false] %s5008_s20 }
  0x19   : > { %s5156_s7 = scalar_lea.vmem %s6545_s0, %s4899_s4  ;;  %s161_s4 = sand.u32 1, %s5056_s13  }
  0x1a   : > { %v170_v4 = vld [vmem:[%s5156_s7] sm:$0xf]  ;;  %v5160_v5 = vld [vmem:[%s5156_s7 + $0x4] sm:$0xf]  ;;  %v5166_v7 = vld [vmem:[%s5156_s7 + $0x8] sm:$0xff]   ;;  %s4898_s5 = smul.u32 144, %s161_s4 }
  0x1b   : > { %v5163_v6 = vcombine.low %v170_v4, %v5160_v5  ;;  %v312_v11 = vshll.u32 %v5166_v7, 16  ;;  %v316_v12 = vshrl.u32 %v5166_v7, 16  ;;  %v5174_v13 = vld [vmem:[%s5156_s7 + $0x50] sm:$0xff]   ;;  %v5177_v14 = vld [vmem:[%s5156_s7 + $0x58] sm:$0xff]   ;;  %v5189_v24 = vld [vmem:[%s5156_s7 + $0x60] sm:$0xff]   ;;  %s6505_s17 = scalar_lea.sflag [#allocation3], %s161_s4 }
  0x1c   : > { %v5180_v15 = vld [vmem:[%s5156_s7 + $0x10] sm:$0xff]   ;;  %v384_v19 = vshll.u32 %v5174_v13, 16  ;;  %v388_v20 = vshrl.u32 %v5174_v13, 16  ;;  %v392_v21 = vshll.u32 %v5177_v14, 16  ;;  %v396_v22 = vshrl.u32 %v5177_v14, 16  ;;  %v5194_v28 = vld [vmem:[%s5156_s7 + $0x18] sm:$0xff]  }
  0x1d   : > { %v305_v9 = vshrl.u32 %v5163_v6, 16  ;;  %v307_v10 = vshll.u32 %v5163_v6, 16  ;;  %v314_v18 = vrot.slane %v312_v11, 1  ;;  %v320_v23 = vshll.u32 %v5180_v15, 16  ;;  %v5207_v37 = vld [vmem:[%s5156_s7 + $0x68] sm:$0xff]   ;;  %v5211_v39 = vld [vmem:[%s5156_s7 + $0x20] sm:$0xff]  }
  0x1e   : > { %v5191_v27 = vrot.slane %v384_v19, 1  ;;  %v394_v29 = vrot.slane %v392_v21, 1  ;;  %v400_v31 = vshll.u32 %v5189_v24, 16  ;;  %v324_v32 = vshrl.u32 %v5180_v15, 16  ;;  %v5216_v44 = vld [vmem:[%s5156_s7 + $0x70] sm:$0xff]   ;;  %v5228_v50 = vld [vmem:[%s5156_s7 + $0x28] sm:$0xff]  }
  0x1f   : > { %v309_v17 = vrot.slane %v307_v10, 1  ;;  %v318_v26 = vor.u32 %v316_v12, %v314_v18  ;;  %v322_v30 = vrot.slane %v320_v23, 1  ;;  %v328_v36 = vshll.u32 %v5194_v28, 16  ;;  %v5243_v62 = vld [vmem:[%s5156_s7 + $0x78] sm:$0xff]   ;;  %v5253_v10 = vld [vmem:[%s5156_s7 + $0x30] sm:$0xff]   ;;  %v5256_v11 = vld [vmem:[%s5156_s7 + $0x80] sm:$0xff]  }
  0x20   : > { %v390_v35 = vor.u32 %v388_v20, %v5191_v27  ;;  %v404_v38 = vshrl.u32 %v5189_v24, 16  ;;  %v398_v40 = vor.u32 %v396_v22, %v394_v29  ;;  %v402_v42 = vrot.slane %v400_v31, 1  ;;  %v5265_v23 = vld [vmem:[%s5156_s7 + $0x38] sm:$0xff]   ;;  %s6413_s6 = scalar_lea.vmem [#allocation2], %s4898_s5  ;;  %s5010_s24 = scalar_lea.vmem %s5009_s20, 4608 }
  0x21   : > { %v310_v25 = vor.u32 %v309_v17, %v305_v9  ;;  %v323_v41 = vsel %vm303_vm1, %v318_v26, %v322_v30  ;;  %v326_v43 = vor.u32 %v324_v32, %v322_v30  ;;  %v330_v47 = vrot.slane %v328_v36, 1  ;;  %v5270_v26 = vld [vmem:[%s5156_s7 + $0x88] sm:$0xff]   ;;  %s3891_s8 = sshll.u32 %s6413_s6, 4  ;;  %s6494_s8 = int_to_ptr.vmem [resolvable:$true] %s3891_s8 }
  0x22   : > { %v395_v46 = vsel %vm303_vm1, %v390_v35, %v394_v29  ;;  %v408_v48 = vshll.u32 %v5207_v37, 16  ;;  %v332_v49 = vshrl.u32 %v5194_v28, 16  ;;  %v403_v51 = vsel %vm303_vm1, %v398_v40, %v402_v42  ;;  %v5282_v40 = vld [vmem:[%s5156_s7 + $0x48] sm:$0xff]   ;;  %p5011_p0 = scmp.lt.s32.totalorder %s6494_s8, %s5009_s20 }
  0x23   : > { %v315_v34 = vsel %vm303_vm1, %v310_v25, %v314_v18  ;;  %4566 = vmatprep.mubr.msk.bf16.mxu1 %vm452_vm2, %v395_v46  ;;  %v406_v52 = vor.u32 %v404_v38, %v402_v42  ;;  %v336_v53 = vshll.u32 %v5211_v39, 16  ;;  %v412_v54 = vshrl.u32 %v5207_v37, 16  ;;  %v5279_v38 = vld [vmem:[%s5156_s7 + $0x40] sm:$0xff]  }
  0x24   : > { %4546 = vmatprep.mubr.msk.bf16.mxu0 %vm452_vm2, %v315_v34  ;;  %4567 = vmatmul.mubr.msk.bf16.vlgmr.msra.gmra.mxu1 %vm452_vm2, %v403_v51  ;;  %v331_v55 = vsel %vm303_vm1, %v326_v43, %v330_v47  ;;  %v410_v56 = vrot.slane %v408_v48, 1  ;;  %v334_v57 = vor.u32 %v332_v49, %v330_v47  ;;  %v416_v58 = vshll.u32 %v5216_v44, 16  ;;  %v4959_v43 = vld [vmem:[%s5156_s7 + $0x90] ss:$0 sps:$4 sm:$0x11]  }
  0x25   : > { %4547 = vmatmul.mubr.msk.bf16.vlgmr.msra.gmra.mxu0 %vm452_vm2, %v323_v41  ;;  %4583 = vmatpush3.bf16.msra.mxu1 %v725_v16  ;;  %v338_v59 = vrot.slane %v336_v53, 1  ;;  %v340_v60 = vshrl.u32 %v5211_v39, 16  ;;  %v344_v61 = vshll.u32 %v5228_v50, 16  ;;  %v420_v2 = vshrl.u32 %v5216_v44, 16 }
  0x26   : > { %4621 = vmatpush3.bf16.msra.mxu0 %v1003_v8  ;;  %4550 = vmatprep.mubr.msk.bf16.mxu0 %vm452_vm2, %v331_v55  ;;  %v411_v63 = vsel %vm303_vm1, %v406_v52, %v410_v56  ;;  %v414_v0 = vor.u32 %v412_v54, %v410_v56  ;;  %v418_v1 = vrot.slane %v416_v58, 1  ;;  %v424_v9 = vshll.u32 %v5243_v62, 16 }
  0x27   : > { %4893 = vmatprep.subr.msk.bf16.mxu0 %vm507_vm0, %v5201_v33  ;;  %4892 = vmatprep.subr.msk.bf16.mxu1 %vm507_vm0, %v5221_v45  ;;  %v339_v3 = vsel %vm303_vm1, %v334_v57, %v338_v59  ;;  %v342_v4 = vor.u32 %v340_v60, %v338_v59  ;;  %v346_v8 = vrot.slane %v344_v61, 1  ;;  %v348_v17 = vshrl.u32 %v5228_v50, 16 }
  0x28   : > { %4570 = vmatprep.mubr.msk.bf16.mxu1 %vm452_vm2, %v411_v63  ;;  %v419_v12 = vsel %vm303_vm1, %v414_v0, %v418_v1  ;;  %v422_v16 = vor.u32 %v420_v2, %v418_v1  ;;  %v428_v18 = vshrl.u32 %v5243_v62, 16  ;;  %v426_v20 = vrot.slane %v424_v9, 1  ;;  %v904_v63 = vld [vmem:[%s5156_s7] sm:$0xe] }
  0x29   : > { %v347_v19 = vsel %vm303_vm1, %v342_v4, %v346_v8  ;;  %v352_v21 = vshll.u32 %v5253_v10, 16  ;;  %v432_v22 = vshll.u32 %v5256_v11, 16  ;;  %v356_v25 = vshrl.u32 %v5253_v10, 16 }
  0x2a   : > { %v427_v29 = vsel %vm303_vm1, %v422_v16, %v426_v20  ;;  %v350_v30 = vor.u32 %v348_v17, %v346_v8  ;;  %v360_v34 = vshll.u32 %v5265_v23, 16  ;;  %v436_v35 = vshrl.u32 %v5256_v11, 16 }
  0x2b   : > { %v354_v31 = vrot.slane %v352_v21, 1  ;;  %v434_v32 = vrot.slane %v432_v22, 1  ;;  %v440_v36 = vshll.u32 %v5270_v26, 16  ;;  %v430_v41 = vor.u32 %v428_v18, %v426_v20 }
  0x2c   : > { %4571 = vmatmul.mubr.msk.bf16.gmra.mxu1 %vm452_vm2, %v419_v12  ;;  %v362_v46 = vrot.slane %v360_v34, 1  ;;  %v368_v49 = vshll.u32 %v5279_v38, 16  ;;  %v364_v52 = vshrl.u32 %v5265_v23, 16  ;;  %v372_v54 = vshrl.u32 %v5279_v38, 16 }
  0x2d   : > { %4551 = vmatmul.mubr.msk.bf16.gmra.mxu0 %vm452_vm2, %v339_v3  ;;  %4574 = vmatprep.mubr.msk.bf16.mxu1 %vm452_vm2, %v427_v29  ;;  %v358_v42 = vor.u32 %v356_v25, %v354_v31  ;;  %v438_v47 = vor.u32 %v436_v35, %v434_v32  ;;  %v442_v48 = vrot.slane %v440_v36, 1  ;;  %v355_v51 = vsel %vm303_vm1, %v350_v30, %v354_v31 }
  0x2e   : > { %4554 = vmatprep.mubr.msk.bf16.mxu0 %vm452_vm2, %v347_v19  ;;  %v376_v55 = vshll.u32 %v5282_v40, 16  ;;  %v435_v56 = vsel %vm303_vm1, %v430_v41, %v434_v32  ;;  %v444_v57 = vshrl.u32 %v5270_v26, 16  ;;  %v448_v58 = vshll.u32 %v4959_v43, 16 }
  0x2f   : > { %v363_v53 = vsel %vm303_vm1, %v358_v42, %v362_v46  ;;  %v443_v59 = vsel %vm303_vm1, %v438_v47, %v442_v48  ;;  %v370_v60 = vrot.slane %v368_v49, 1  ;;  %v366_v61 = vor.u32 %v364_v52, %v362_v46  ;;  %v5381_v46 = vld [vmem:[%s5156_s7 + $0x10] sm:$0xff]   ;;  %v5386_v49 = vld [vmem:[%s5156_s7 + $0x18] sm:$0xff]  }
  0x30   : > { %v378_v1 = vrot.slane %v376_v55, 1  ;;  %v446_v2 = vor.u32 %v444_v57, %v442_v48  ;;  %v450_v3 = vrot.slane %v448_v58, 1  ;;  %v380_v8 = vshrl.u32 %v5282_v40, 16  ;;  %v5399_v55 = vld [vmem:[%s5156_s7 + $0x30] sm:$0xff]  }
  0x31   : > { %v374_v0 = vor.u32 %v372_v54, %v370_v60  ;;  %v371_v4 = vsel %vm303_vm1, %v366_v61, %v370_v60  ;;  %v4015_v12 = vcombine.low %v904_v63, %v5160_v5  ;;  %v944_v17 = vrot.slane %v5270_v26, 1  ;;  %v5414_v61 = vld [vmem:[%s5156_s7 + $0x38] sm:$0xff]  }
  0x32   : > { %v451_v16 = vsel %vm303_vm1, %v446_v2, %v450_v3  ;;  %v382_v18 = vor.u32 %v380_v8, %v378_v1  ;;  %v946_v19 = vrot.slane %v4959_v43, 1  ;;  %v912_v21 = vrot.slane %v5166_v7, 1  ;;  %v2104_v43 = vld [vmem:[%s5156_s7 + $0x8] sm:$0xc]  ;;  %v5424_v2 = vld [vmem:[%s5156_s7 + $0x40] sm:$0xff]  }
  0x33   : > { %v379_v9 = vsel %vm303_vm1, %v374_v0, %v378_v1  ;;  %v911_v20 = vrot.slane %v4015_v12, 1  ;;  %v1442_v29 = vsel %vm507_vm0, %v5221_v45, 0  ;;  %v914_v30 = vrot.slane %v5180_v15, 1  ;;  %v5432_v8 = vld [vmem:[%s5156_s7 + $0x48] sm:$0xff]  }
  0x34   : > { %4575 = vmatmul.mubr.msk.bf16.gmra.mxu1 %vm452_vm2, %v435_v56  ;;  %v5315_v5 = vsel %vm910_vm3, %v944_v17, %v946_v19  ;;  %v387_v22 = vsel %vm303_vm1, %v382_v18, %v5191_v27  ;;  %v916_v27 = vrot.slane %v5194_v28, 1  ;;  %v1889_v31 = vsel %vm507_vm0, %v5201_v33, 0 }
  0x35   : > { %4555 = vmatmul.mubr.msk.bf16.gmra.mxu0 %vm452_vm2, %v355_v51  ;;  %4578 = vmatprep.mubr.msk.bf16.mxu1 %vm452_vm2, %v443_v59  ;;  %v913_v25 = vsel %vm910_vm3, %v911_v20, %v912_v21  ;;  %v915_v45 = vsel %vm910_vm3, %v912_v21, %v914_v30  ;;  %v920_v34 = vrot.slane %v5228_v50, 1  ;;  %v924_v36 = vrot.slane %v5265_v23, 1  ;;  %v5390_v51 = vld [vmem:[%s5156_s7 + $0x20] sm:$0xff]  }
  0x36   : > { %4558 = vmatprep.mubr.msk.bf16.mxu0 %vm452_vm2, %v363_v53  ;;  %v917_v32 = vsel %vm910_vm3, %v914_v30, %v916_v27  ;;  %v926_v42 = vrot.slane %v5279_v38, 1  ;;  %v2112_v53 = vrot.slane %v5381_v46, 2  ;;  %v2114_v54 = vrot.slane %v5386_v49, 2  ;;  %v5462_v30 = vld [vmem:[%s5156_s7 + $0x58] sm:$0xff]  }
  0x37   : > { %v2116_v57 = vrot.slane %v5390_v51, 2  ;;  %v930_v58 = vrot.slane %v5174_v13, 1  ;;  %v932_v59 = vrot.slane %v5177_v14, 1  ;;  %v2120_v1 = vrot.slane %v5399_v55, 2 }
  0x38   : > { %v927_v48 = vsel %vm910_vm3, %v924_v36, %v926_v42  ;;  %v5409_v60 = vsel %vm2110_vm4, %v2112_v53, %v2114_v54  ;;  %v2126_v18 = vrot.slane %v5432_v8, 2  ;;  %v934_v20 = vrot.slane %v5189_v24, 1 }
  0x39   : > { %v5417_v63 = vsel %vm2110_vm4, %v2114_v54, %v2116_v57 }
  0x3c   : > { %4579 = vmatmul.mubr.msk.bf16.gmra.mxu1 %vm452_vm2, %v451_v16  ;;  %v2124_v16 = vrot.slane %v5424_v2, 2 }
  0x3d   : > { %4559 = vmatmul.mubr.msk.bf16.gmra.mxu0 %vm452_vm2, %v371_v4  ;;  %4584 = vmatprep.mubr.msk.bf16.mxu1 %vm452_vm2, %v5163_v6  ;;  %v5328_v6 = vld [vmem:[%s6546_s1 + $0xa] sm:$0x3]  ;;  %v2122_v4 = vrot.slane %v5414_v61, 2 }
  0x3e   : > { %4562 = vmatprep.mubr.msk.bf16.mxu0 %vm452_vm2, %v379_v9  ;;  %v5450_v21 = vsel %vm2110_vm4, %v2124_v16, %v2126_v18 }
  0x3f   : > { %v5439_v12 = vsel %vm2110_vm4, %v2120_v1, %v2122_v4  ;;  %v5445_v19 = vsel %vm2110_vm4, %v2122_v4, %v2124_v16 }
  0x44   : > { %4585 = vmatmul.mubr.msk.bf16.vlgmr.msra.gmra.mxu1 %vm452_vm2, %v5166_v7  ;;  %v5344_v7 = vld [vmem:[%s6546_s1 + $0xc] sm:$0x3] }
  0x45   : > { %4563 = vmatmul.mubr.msk.bf16.gmra.mxu0 %vm452_vm2, %v387_v22  ;;  %4659 = vmatpush3.bf16.msra.mxu1 %v1442_v29  ;;  %v936_v22 = vrot.slane %v5207_v37, 1  ;;  %v935_v29 = vsel %vm910_vm3, %v932_v59, %v934_v20 }
  0x46   : > { %4622 = vmatprep.mubr.msk.bf16.mxu0 %vm452_vm2, %v913_v25  ;;  %4588 = vmatprep.mubr.msk.bf16.mxu1 %vm452_vm2, %v5180_v15  ;;  %v918_v15 = vrot.slane %v5211_v39, 1  ;;  %v5458_v25 = vld [vmem:[%s5156_s7 + $0x50] sm:$0xff]  }
  0x47   : > { %4894 = vmatprep.subr.msk.bf16.mxu1 %vm507_vm0, %v5328_v6 }
  0x48   : > { %v919_v33 = vsel %vm910_vm3, %v916_v27, %v918_v15  ;;  %v921_v35 = vsel %vm910_vm3, %v918_v15, %v920_v34  ;;  %v937_v27 = vsel %vm910_vm3, %v934_v20, %v936_v22  ;;  %v940_v15 = vrot.slane %v5243_v62, 1 }
  0x4c   : > { %4589 = vmatmul.mubr.msk.bf16.gmra.mxu1 %vm452_vm2, %v5194_v28  ;;  %v922_v28 = vrot.slane %v5253_v10, 1 }
  0x4d   : > { %4623 = vmatmul.mubr.msk.bf16.vlgmr.msra.gmra.mxu0 %vm452_vm2, %v915_v45  ;;  %4592 = vmatprep.mubr.msk.bf16.mxu1 %vm452_vm2, %v5211_v39  ;;  %v2128_v45 = vrot.slane %v5458_v25, 2 }
  0x4e   : > { %4697 = vmatpush3.bf16.msra.mxu0 %v1889_v31  ;;  %4626 = vmatprep.mubr.msk.bf16.mxu0 %vm452_vm2, %v917_v32  ;;  %v923_v39 = vsel %vm910_vm3, %v920_v34, %v922_v28  ;;  %v925_v41 = vsel %vm910_vm3, %v922_v28, %v924_v36  ;;  %v1218_v34 = vld [vmem:[%s5156_s7 + $0x8] sm:$0xe] }
  0x4f   : > { %4895 = vmatprep.subr.msk.bf16.mxu0 %vm507_vm0, %v5344_v7  ;;  %v5469_v31 = vsel %vm2110_vm4, %v2126_v18, %v2128_v45  ;;  %v5487_v28 = vld [vmem:[%s5156_s7 + $0x68] sm:$0xff]  }
  0x54   : > { %4593 = vmatmul.mubr.msk.bf16.gmra.mxu1 %vm452_vm2, %v5228_v50  ;;  %v928_v50 = vrot.slane %v5282_v40, 1 }
  0x55   : > { %4627 = vmatmul.mubr.msk.bf16.gmra.mxu0 %vm452_vm2, %v919_v33  ;;  %4596 = vmatprep.mubr.msk.bf16.mxu1 %vm452_vm2, %v5253_v10  ;;  %v5378_v10 = vld [vmem:[%s5156_s7 + $0xc] sm:$0xf]  ;;  %v5483_v33 = vld [vmem:[%s5156_s7 + $0x60] sm:$0xff]  }
  0x56   : > { %4630 = vmatprep.mubr.msk.bf16.mxu0 %vm452_vm2, %v921_v35  ;;  %v4093_v47 = vcombine.low %v2104_v43, %v5378_v10 }
  0x58   : > { %v2111_v52 = vrot.slane %v4093_v47, 2  ;;  %v1673_v47 = vshrl.u32 %v5381_v46, 16 }
  0x5a   : > { %v5402_v56 = vsel %vm2110_vm4, %v2111_v52, %v2112_v53  ;;  %v1351_v52 = vrot.slane %v5381_v46, 1  ;;  %v5510_v53 = vld [vmem:[%s5156_s7 + $0x70] sm:$0xff]  }
  0x5b   : > { %v2136_v4 = vrot.slane %v5510_v53, 2 }
  0x5c   : > { %4597 = vmatmul.mubr.msk.bf16.gmra.mxu1 %vm452_vm2, %v5265_v23  ;;  %v929_v23 = vsel %vm910_vm3, %v926_v42, %v928_v50  ;;  %v942_v42 = vrot.slane %v5256_v11, 1 }
  0x5d   : > { %4631 = vmatmul.mubr.msk.bf16.gmra.mxu0 %vm452_vm2, %v923_v39  ;;  %4600 = vmatprep.mubr.msk.bf16.mxu1 %vm452_vm2, %v5279_v38  ;;  %v5394_v38 = vld [vmem:[%s5156_s7 + $0x28] sm:$0xff]   ;;  %v2132_v39 = vrot.slane %v5483_v33, 2 }
  0x5e   : > { %4634 = vmatprep.mubr.msk.bf16.mxu0 %vm452_vm2, %v925_v41  ;;  %v2118_v0 = vrot.slane %v5394_v38, 2  ;;  %v4035_v41 = vcombine.low %v1218_v34, %v5378_v10  ;;  %v943_v54 = vsel %vm910_vm3, %v940_v15, %v942_v42  ;;  %v5543_v34 = vld [vmem:[%s5156_s7 + $0x88] sm:$0xff]  }
  0x60   : > { %v5427_v3 = vsel %vm2110_vm4, %v2116_v57, %v2118_v0  ;;  %v5435_v9 = vsel %vm2110_vm4, %v2118_v0, %v2120_v1  ;;  %v1665_v43 = vshrl.u32 %v4035_v41, 16  ;;  %v1668_v10 = vshll.u32 %v4035_v41, 16 }
  0x61   : > { %v945_v57 = vsel %vm910_vm3, %v942_v42, %v944_v17  ;;  %v1675_v0 = vrot.slane %v1673_v47, 1  ;;  %v1682_v17 = vshrl.u32 %v5386_v49, 16  ;;  %v1703_v47 = vshll.u32 %v5394_v38, 16 }
  0x64   : > { %4601 = vmatmul.mubr.msk.bf16.gmra.mxu1 %vm452_vm2, %v5282_v40  ;;  %v931_v40 = vsel %vm910_vm3, %v928_v50, %v930_v58 }
  0x65   : > { %4635 = vmatmul.mubr.msk.bf16.gmra.mxu0 %vm452_vm2, %v927_v48  ;;  %4604 = vmatprep.mubr.msk.bf16.mxu1 %vm452_vm2, %v5174_v13  ;;  %v933_v13 = vsel %vm910_vm3, %v930_v58, %v932_v59  ;;  %v1676_v48 = vshll.u32 %v5381_v46, 16  ;;  %v5517_v58 = vld [vmem:[%s5156_s7 + $0x78] sm:$0xff]   ;;  %v1670_v59 = vrot.slane %v1668_v10, 2  ;;  %v1700_v10 = vshrl.u32 %v5394_v38, 16 }
  0x66   : > { %4638 = vmatprep.mubr.msk.bf16.mxu0 %vm452_vm2, %v929_v23  ;;  %v1350_v23 = vrot.slane %v4035_v41, 1 }
  0x67   : > { %v1678_v1 = vrot.slane %v1676_v48, 2 }
  0x68   : > { %v1352_v46 = vsel %vm910_vm3, %v1350_v23, %v1351_v52  ;;  %v1709_v23 = vshrl.u32 %v5399_v55, 16 }
  0x69   : > { %v1679_v20 = vor.u32 %v1678_v1, %v1675_v0  ;;  %v2642_v0 = vsel %vm507_vm0, %v5344_v7, 0  ;;  %v1702_v1 = vrot.slane %v1700_v10, 1 }
  0x6c   : > { %4605 = vmatmul.mubr.msk.bf16.gmra.mxu1 %vm452_vm2, %v5177_v14  ;;  %v2130_v14 = vrot.slane %v5462_v30, 2 }
  0x6d   : > { %4639 = vmatmul.mubr.msk.bf16.gmra.mxu0 %vm452_vm2, %v931_v40  ;;  %4608 = vmatprep.mubr.msk.bf16.mxu1 %vm452_vm2, %v5189_v24  ;;  %v938_v24 = vrot.slane %v5216_v44, 1 }
  0x6e   : > { %4642 = vmatprep.mubr.msk.bf16.mxu0 %vm452_vm2, %v933_v13  ;;  %v5474_v32 = vsel %vm2110_vm4, %v2128_v45, %v2130_v14  ;;  %v1685_v13 = vshll.u32 %v5386_v49, 16  ;;  %v1355_v45 = vrot.slane %v5390_v51, 1 }
  0x6f   : > { %v939_v35 = vsel %vm910_vm3, %v936_v22, %v938_v24  ;;  %v941_v36 = vsel %vm910_vm3, %v938_v24, %v940_v15  ;;  %v1691_v22 = vshrl.u32 %v5390_v51, 16  ;;  %v1684_v24 = vrot.slane %v1682_v17, 1 }
  0x70   : > { %v1687_v15 = vrot.slane %v1685_v13, 2  ;;  %v1711_v17 = vrot.slane %v1709_v23, 1 }
  0x74   : > { %4609 = vmatmul.mubr.msk.bf16.gmra.mxu1 %vm452_vm2, %v5207_v37  ;;  %v2134_v37 = vrot.slane %v5487_v28, 2 }
  0x75   : > { %4643 = vmatmul.mubr.msk.bf16.gmra.mxu0 %vm452_vm2, %v935_v29  ;;  %4612 = vmatprep.mubr.msk.bf16.mxu1 %vm452_vm2, %v5216_v44  ;;  %v5495_v44 = vsel %vm2110_vm4, %v2130_v14, %v2132_v39  ;;  %v1694_v29 = vshll.u32 %v5390_v51, 16  ;;  %v5540_v14 = vld [vmem:[%s5156_s7 + $0x80] sm:$0xff]  }
  0x76   : > { %4646 = vmatprep.mubr.msk.bf16.mxu0 %vm452_vm2, %v937_v27  ;;  %v5500_v50 = vsel %vm2110_vm4, %v2132_v39, %v2134_v37  ;;  %v5524_v40 = vsel %vm2110_vm4, %v2134_v37, %v2136_v4  ;;  %v1353_v27 = vrot.slane %v5386_v49, 1  ;;  %v2140_v39 = vrot.slane %v5540_v14, 2 }
  0x77   : > { %v2142_v37 = vrot.slane %v5543_v34, 2  ;;  %v2203_v49 = vsel %vm507_vm0, %v5328_v6, 0 }
  0x78   : > { %v1354_v41 = vsel %vm910_vm3, %v1351_v52, %v1353_v27  ;;  %v1356_v51 = vsel %vm910_vm3, %v1353_v27, %v1355_v45  ;;  %v1712_v52 = vshll.u32 %v5399_v55, 16  ;;  %v1718_v27 = vshrl.u32 %v5414_v61, 16 }
  0x79   : > { %v5566_v6 = vsel %vm2110_vm4, %v2140_v39, %v2142_v37 }
  0x7c   : > { %4613 = vmatmul.mubr.msk.bf16.gmra.mxu1 %vm452_vm2, %v5243_v62  ;;  %v1667_v62 = vrot.slane %v1665_v43, 1  ;;  %v1688_v43 = vor.u32 %v1687_v15, %v1684_v24 }
  0x7d   : > { %4647 = vmatmul.mubr.msk.bf16.gmra.mxu0 %vm452_vm2, %v939_v35  ;;  %4616 = vmatprep.mubr.msk.bf16.mxu1 %vm452_vm2, %v5256_v11  ;;  %v2138_v11 = vrot.slane %v5517_v58, 2  ;;  %v1693_v35 = vrot.slane %v1691_v22, 1 }
  0x7e   : > { %4650 = vmatprep.mubr.msk.bf16.mxu0 %vm452_vm2, %v941_v36  ;;  %v1671_v18 = vor.u32 %v1670_v59, %v1667_v62  ;;  %v1696_v36 = vrot.slane %v1694_v29, 2  ;;  %v5575_v62 = vld [vmem:[%s5156_s7 + $0x90] sm:$0xff]   ;;  %v1689_v59 = vsel %vm1663_vm5, %v1679_v20, %v1688_v43 }
  0x7f   : > { %v5530_v16 = vsel %vm2110_vm4, %v2136_v4, %v2138_v11  ;;  %v5555_v42 = vsel %vm2110_vm4, %v2138_v11, %v2140_v39  ;;  %v1705_v4 = vrot.slane %v1703_v47, 2  ;;  %v5583_v11 = vld [vmem:[%s5156_s7 + $0x98] ss:$0 sps:$4 sm:$0x33]   ;;  %v1363_v39 = vrot.slane %v5424_v2, 1 }
  0x80   : > { %v1697_v48 = vor.u32 %v1696_v36, %v1693_v35  ;;  %v1730_v35 = vshll.u32 %v5424_v2, 16  ;;  %v1361_v36 = vrot.slane %v5414_v61, 1 }
  0x81   : > { %v1706_v29 = vor.u32 %v1705_v4, %v1702_v1  ;;  %v5628_v1 = vld [vmem:[%s5156_s7 + $0x14] sm:$0xf]  ;;  %v3304_v4 = vld [vmem:[%s5156_s7 + $0x10] sm:$0x8] }
  0x82   : > { %v1732_v10 = vrot.slane %v1730_v35, 2  ;;  %v1364_v23 = vsel %vm910_vm3, %v1361_v36, %v1363_v39 }
  0x84   : > { %4617 = vmatmul.mubr.msk.bf16.gmra.mxu1 %vm452_vm2, %v5270_v26  ;;  %v1680_v26 = vsel %vm1663_vm5, %v1671_v18, %v1679_v20  ;;  %v5591_v18 = vld [vmem:[%s6546_s1 + $0x10] sm:$0x3]  ;;  %v2146_v20 = vrot.slane %v5583_v11, 2 }
  0x85   : > { %4651 = vmatmul.mubr.msk.bf16.gmra.mxu0 %vm452_vm2, %v943_v54  ;;  %4660 = vmatprep.mubr.msk.bf16.mxu1 %vm452_vm2, %v1352_v46  ;;  %v1357_v54 = vrot.slane %v5394_v38, 1  ;;  %v1698_v46 = vsel %vm1663_vm5, %v1688_v43, %v1697_v48  ;;  %v1714_v38 = vrot.slane %v1712_v52, 2 }
  0x86   : > { %4654 = vmatprep.mubr.msk.bf16.mxu0 %vm452_vm2, %v945_v57  ;;  %v1359_v57 = vrot.slane %v5399_v55, 1  ;;  %v2144_v55 = vrot.slane %v5575_v62, 2 }
  0x87   : > { %v1358_v13 = vsel %vm910_vm3, %v1355_v45, %v1357_v54  ;;  %v1721_v45 = vshll.u32 %v5414_v61, 16  ;;  %v1715_v15 = vor.u32 %v1714_v38, %v1711_v17 }
  0x88   : > { %v1360_v7 = vsel %vm910_vm3, %v1357_v54, %v1359_v57  ;;  %v5597_v22 = vsel %vm2110_vm4, %v2142_v37, %v2144_v55  ;;  %v5603_v24 = vsel %vm2110_vm4, %v2144_v55, %v2146_v20  ;;  %v1720_v37 = vrot.slane %v1718_v27, 1  ;;  %v5633_v55 = vld [vmem:[%s5156_s7 + $0x18] sm:$0xff]   ;;  %v5638_v27 = vld [vmem:[%s5156_s7 + $0x20] sm:$0xff]  }
  0x89   : > { %v1362_v47 = vsel %vm910_vm3, %v1359_v57, %v1361_v36  ;;  %v1745_v54 = vshrl.u32 %v5458_v25, 16  ;;  %v1748_v57 = vshll.u32 %v5458_v25, 16  ;;  %v1754_v36 = vshrl.u32 %v5462_v30, 16 }
  0x8c   : > { %4661 = vmatmul.mubr.msk.bf16.vlgmr.msra.gmra.mxu1 %vm452_vm2, %v1354_v41  ;;  %v1707_v41 = vsel %vm1663_vm5, %v1697_v48, %v1706_v29  ;;  %v1739_v48 = vshll.u32 %v5432_v8, 16 }
  0x8d   : > { %4655 = vmatmul.mubr.msk.bf16.gmra.mxu0 %vm452_vm2, %v5315_v5  ;;  %v5563_v5 = vld [vmem:[%s6546_s1 + $0xe] sm:$0x3]  ;;  %4735 = vmatpush3.bf16.msra.mxu1 %v2203_v49  ;;  %v1723_v49 = vrot.slane %v1721_v45, 2  ;;  %v3312_v45 = vrot.slane %v5633_v55, 3 }
  0x8e   : > { %4698 = vmatprep.mubr.msk.bf16.mxu0 %vm452_vm2, %v1680_v26  ;;  %4664 = vmatprep.mubr.msk.bf16.mxu1 %vm452_vm2, %v1356_v51  ;;  %v1727_v26 = vshrl.u32 %v5424_v2, 16  ;;  %v1716_v51 = vsel %vm1663_vm5, %v1706_v29, %v1715_v15  ;;  %v1736_v2 = vshrl.u32 %v5432_v8, 16  ;;  %v1741_v38 = vrot.slane %v1739_v48, 2 }
  0x8f   : > { %4896 = vmatprep.subr.msk.bf16.mxu1 %vm507_vm0, %v5563_v5  ;;  %v1724_v61 = vor.u32 %v1723_v49, %v1720_v37  ;;  %v1750_v29 = vrot.slane %v1748_v57, 2  ;;  %v1763_v49 = vshrl.u32 %v5483_v33, 16 }
  0x90   : > { %v1729_v43 = vrot.slane %v1727_v26, 1  ;;  %v1738_v17 = vrot.slane %v1736_v2, 1  ;;  %v6549_v26 = vrot.slane %v5638_v27, 3 }
  0x92   : > { %v1733_v52 = vor.u32 %v1732_v10, %v1729_v43  ;;  %v1742_v35 = vor.u32 %v1741_v38, %v1738_v17  ;;  %v5657_v43 = vsel %vm3310_vm6, %v3312_v45, %v6549_v26  ;;  %v1369_v10 = vrot.slane %v5462_v30, 1 }
  0x93   : > { %v1781_v17 = vshrl.u32 %v5510_v53, 16  ;;  %v1784_v38 = vshll.u32 %v5510_v53, 16 }
  0x94   : > { %4665 = vmatmul.mubr.msk.bf16.gmra.mxu1 %vm452_vm2, %v1358_v13  ;;  %v4171_v13 = vcombine.low %v3304_v4, %v5628_v1  ;;  %v1734_v20 = vsel %vm1663_vm5, %v1724_v61, %v1733_v52 }
  0x95   : > { %4699 = vmatmul.mubr.msk.bf16.vlgmr.msra.gmra.mxu0 %vm452_vm2, %v1689_v59  ;;  %4668 = vmatprep.mubr.msk.bf16.mxu1 %vm452_vm2, %v1360_v7  ;;  %v1365_v59 = vrot.slane %v5432_v8, 1  ;;  %v1747_v7 = vrot.slane %v1745_v54, 1  ;;  %v1765_v54 = vrot.slane %v1763_v49, 1  ;;  %v1802_v49 = vshll.u32 %v5540_v14, 16 }
  0x96   : > { %4773 = vmatpush3.bf16.msra.mxu0 %v2642_v0  ;;  %4702 = vmatprep.mubr.msk.bf16.mxu0 %vm452_vm2, %v1698_v46  ;;  %v1367_v0 = vrot.slane %v5458_v25, 1  ;;  %v1725_v46 = vsel %vm1663_vm5, %v1715_v15, %v1724_v61  ;;  %v3311_v25 = vrot.slane %v4171_v13, 3  ;;  %v1756_v61 = vrot.slane %v1754_v36, 1 }
  0x97   : > { %4897 = vmatprep.subr.msk.bf16.mxu0 %vm507_vm0, %v5591_v18  ;;  %v1366_v8 = vsel %vm910_vm3, %v1363_v39, %v1365_v59  ;;  %v1751_v39 = vor.u32 %v1750_v29, %v1747_v7  ;;  %v1375_v13 = vrot.slane %v5510_v53, 1  ;;  %v1793_v53 = vshll.u32 %v5517_v58, 16 }
  0x98   : > { %v1368_v15 = vsel %vm910_vm3, %v1365_v59, %v1367_v0  ;;  %v5649_v37 = vsel %vm3310_vm6, %v3311_v25, %v3312_v45  ;;  %v1370_v59 = vsel %vm910_vm3, %v1367_v0, %v1369_v10  ;;  %v1373_v0 = vrot.slane %v5487_v28, 1 }
  0x99   : > { %v1752_v48 = vsel %vm1663_vm5, %v1742_v35, %v1751_v39  ;;  %v1783_v25 = vrot.slane %v1781_v17, 1  ;;  %v1786_v45 = vrot.slane %v1784_v38, 2  ;;  %v1383_v17 = vrot.slane %v5575_v62, 1 }
  0x9c   : > { %4669 = vmatmul.mubr.msk.bf16.gmra.mxu1 %vm452_vm2, %v1362_v47  ;;  %v1371_v47 = vrot.slane %v5483_v33, 1 }
  0x9d   : > { %4703 = vmatmul.mubr.msk.bf16.gmra.mxu0 %vm452_vm2, %v1707_v41  ;;  %4672 = vmatprep.mubr.msk.bf16.mxu1 %vm452_vm2, %v1364_v23  ;;  %v1757_v41 = vshll.u32 %v5462_v30, 16  ;;  %v1743_v23 = vsel %vm1663_vm5, %v1733_v52, %v1742_v35  ;;  %v1772_v30 = vshrl.u32 %v5487_v28, 16  ;;  %v1376_v35 = vsel %vm910_vm3, %v1373_v0, %v1375_v13 }
  0x9e   : > { %4706 = vmatprep.mubr.msk.bf16.mxu0 %vm452_vm2, %v1716_v51  ;;  %v1766_v51 = vshll.u32 %v5483_v33, 16  ;;  %v1372_v4 = vsel %vm910_vm3, %v1369_v10, %v1371_v47  ;;  %v1775_v33 = vshll.u32 %v5487_v28, 16  ;;  %v1790_v28 = vshrl.u32 %v5517_v58, 16 }
  0x9f   : > { %v1759_v2 = vrot.slane %v1757_v41, 2  ;;  %v1774_v7 = vrot.slane %v1772_v30, 1  ;;  %v1787_v41 = vor.u32 %v1786_v45, %v1783_v25  ;;  %v1379_v10 = vrot.slane %v5540_v14, 1  ;;  %v4980_v25 = vld [vmem:[%s5156_s7 + $0x98] ss:$0 sps:$4 sm:$0x11]  }
  0xa0   : > { %v1768_v57 = vrot.slane %v1766_v51, 2  ;;  %v1777_v29 = vrot.slane %v1775_v33, 2  ;;  %v1377_v51 = vrot.slane %v5517_v58, 1  ;;  %v1808_v58 = vshrl.u32 %v5543_v34, 16 }
  0xa1   : > { %v1817_v30 = vshrl.u32 %v5575_v62, 16  ;;  %v1820_v33 = vshll.u32 %v5575_v62, 16  ;;  %v1826_v62 = vshrl.u32 %v5583_v11, 16 }
  0xa2   : > { %v1769_v52 = vor.u32 %v1768_v57, %v1765_v54  ;;  %v1778_v36 = vor.u32 %v1777_v29, %v1774_v7  ;;  %v1804_v54 = vrot.slane %v1802_v49, 2  ;;  %v1378_v57 = vsel %vm910_vm3, %v1375_v13, %v1377_v51 }
  0xa3   : > { %v1819_v7 = vrot.slane %v1817_v30, 1  ;;  %v1822_v29 = vrot.slane %v1820_v33, 2  ;;  %v5768_v30 = vld [vmem:[%s5156_s7 + $0x48] sm:$0xff]  }
  0xa4   : > { %4673 = vmatmul.mubr.msk.bf16.gmra.mxu1 %vm452_vm2, %v1366_v8 }
  0xa5   : > { %4707 = vmatmul.mubr.msk.bf16.gmra.mxu0 %vm452_vm2, %v1725_v46  ;;  %4676 = vmatprep.mubr.msk.bf16.mxu1 %vm452_vm2, %v1368_v15  ;;  %v1760_v46 = vor.u32 %v1759_v2, %v1756_v61  ;;  %v1374_v15 = vsel %vm910_vm3, %v1371_v47, %v1373_v0  ;;  %v1779_v47 = vsel %vm1663_vm5, %v1769_v52, %v1778_v36  ;;  %v1795_v61 = vrot.slane %v1793_v53, 2 }
  0xa6   : > { %4710 = vmatprep.mubr.msk.bf16.mxu0 %vm452_vm2, %v1734_v20  ;;  %v1788_v2 = vsel %vm1663_vm5, %v1778_v36, %v1787_v41  ;;  %v1810_v0 = vrot.slane %v1808_v58, 1  ;;  %v1385_v36 = vrot.slane %v4980_v25, 1  ;;  %v5752_v58 = vld [vmem:[%s5156_s7 + $0x38] sm:$0xff]  }
  0xa7   : > { %v1761_v20 = vsel %vm1663_vm5, %v1751_v39, %v1760_v46  ;;  %v1770_v8 = vsel %vm1663_vm5, %v1760_v46, %v1769_v52  ;;  %v1799_v39 = vshrl.u32 %v5540_v14, 16  ;;  %v1811_v14 = vshll.u32 %v5543_v34, 16 }
  0xa8   : > { %v1381_v52 = vrot.slane %v5543_v34, 1 }
  0xa9   : > { %v1813_v13 = vrot.slane %v1811_v14, 2  ;;  %v5764_v14 = vld [vmem:[%s5156_s7 + $0x40] sm:$0xff]  }
  0xaa   : > { %v1384_v45 = vsel %vm910_vm3, %v1381_v52, %v1383_v17 }
  0xab   : > { %v1814_v34 = vor.u32 %v1813_v13, %v1810_v0 }
  0xac   : > { %4677 = vmatmul.mubr.msk.bf16.gmra.mxu1 %vm452_vm2, %v1370_v59  ;;  %v1380_v59 = vsel %vm910_vm3, %v1377_v51, %v1379_v10 }
  0xad   : > { %4711 = vmatmul.mubr.msk.bf16.gmra.mxu0 %vm452_vm2, %v1743_v23  ;;  %4680 = vmatprep.mubr.msk.bf16.mxu1 %vm452_vm2, %v1372_v4  ;;  %v1792_v23 = vrot.slane %v1790_v28, 1  ;;  %v2418_v28 = vld [vmem:[%s5156_s7 + $0x10] sm:$0xc] }
  0xae   : > { %4714 = vmatprep.mubr.msk.bf16.mxu0 %vm452_vm2, %v1752_v48  ;;  %v1801_v48 = vrot.slane %v1799_v39, 1  ;;  %v5719_v51 = vcombine.low %v2418_v28, %v5628_v1 }
  0xaf   : > { %v1796_v4 = vor.u32 %v1795_v61, %v1792_v23  ;;  %v2551_v23 = vrot.slane %v5633_v55, 2 }
  0xb0   : > { %v1805_v46 = vor.u32 %v1804_v54, %v1801_v48  ;;  %v3089_v48 = vsel %vm507_vm0, %v5563_v5, 0  ;;  %v2553_v54 = vrot.slane %v5638_v27, 2  ;;  %v3403_v5 = vsel %vm507_vm0, %v5591_v18, 0 }
  0xb1   : > { %v1797_v38 = vsel %vm1663_vm5, %v1787_v41, %v1796_v4  ;;  %v1828_v41 = vrot.slane %v1826_v62, 1 }
  0xb2   : > { %v1815_v53 = vsel %vm1663_vm5, %v1805_v46, %v1814_v34 }
  0xb4   : > { %4681 = vmatmul.mubr.msk.bf16.gmra.mxu1 %vm452_vm2, %v1374_v15  ;;  %v1829_v15 = vshll.u32 %v5583_v11, 16 }
  0xb5   : > { %4715 = vmatmul.mubr.msk.bf16.gmra.mxu0 %vm452_vm2, %v1761_v20  ;;  %4684 = vmatprep.mubr.msk.bf16.mxu1 %vm452_vm2, %v1376_v35  ;;  %v1806_v20 = vsel %vm1663_vm5, %v1796_v4, %v1805_v46  ;;  %v1823_v35 = vor.u32 %v1822_v29, %v1819_v7 }
  0xb6   : > { %4718 = vmatprep.mubr.msk.bf16.mxu0 %vm452_vm2, %v1770_v8  ;;  %v1382_v8 = vsel %vm910_vm3, %v1379_v10, %v1381_v52  ;;  %v1831_v39 = vrot.slane %v1829_v15, 2  ;;  %v1386_v10 = vsel %vm910_vm3, %v1383_v17, %v1385_v36  ;;  %v2563_v17 = vrot.slane %v5768_v30, 2 }
  0xb7   : > { %v1824_v49 = vsel %vm1663_vm5, %v1814_v34, %v1823_v35 }
  0xb8   : > { %v1832_v11 = vor.u32 %v1831_v39, %v1828_v41 }
  0xba   : > { %v1833_v1 = vsel %vm1663_vm5, %v1823_v35, %v1832_v11 }
  0xbc   : > { %4685 = vmatmul.mubr.msk.bf16.gmra.mxu1 %vm452_vm2, %v1378_v57  ;;  %v2554_v57 = vsel %vm2110_vm4, %v2551_v23, %v2553_v54 }
  0xbd   : > { %4719 = vmatmul.mubr.msk.bf16.gmra.mxu0 %vm452_vm2, %v1779_v47  ;;  %4688 = vmatprep.mubr.msk.bf16.mxu1 %vm452_vm2, %v1380_v59  ;;  %v2550_v47 = vrot.slane %v5719_v51, 2  ;;  %v5746_v59 = vld [vmem:[%s5156_s7 + $0x30] sm:$0xff]  }
  0xbe   : > { %4722 = vmatprep.mubr.msk.bf16.mxu0 %vm452_vm2, %v1788_v2  ;;  %v5732_v2 = vld [vmem:[%s5156_s7 + $0x28] sm:$0xff]  }
  0xbf   : > { %v2552_v61 = vsel %vm2110_vm4, %v2550_v47, %v2551_v23 }
  0xc4   : > { %4689 = vmatmul.mubr.msk.bf16.gmra.mxu1 %vm452_vm2, %v1382_v8  ;;  %v5798_v8 = vld [vmem:[%s5156_s7 + $0x58] sm:$0xff]  }
  0xc5   : > { %4723 = vmatmul.mubr.msk.bf16.gmra.mxu0 %vm452_vm2, %v1797_v38  ;;  %4692 = vmatprep.mubr.msk.bf16.mxu1 %vm452_vm2, %v1384_v45  ;;  %v2567_v15 = vrot.slane %v5798_v8, 2 }
  0xc6   : > { %4726 = vmatprep.mubr.msk.bf16.mxu0 %vm452_vm2, %v1806_v20  ;;  %v5790_v20 = vld [vmem:[%s5156_s7 + $0x50] sm:$0xff]  }
  0xc7   : > { %v2565_v45 = vrot.slane %v5790_v20, 2 }
  0xc9   : > { %v2566_v28 = vsel %vm2110_vm4, %v2563_v17, %v2565_v45 }
  0xcc   : > { %4693 = vmatmul.mubr.msk.bf16.gmra.mxu1 %vm452_vm2, %v1386_v10 }
  0xcd   : > { %4727 = vmatmul.mubr.msk.bf16.gmra.mxu0 %vm452_vm2, %v1815_v53  ;;  %4736 = vmatprep.mubr.msk.bf16.mxu1 %vm452_vm2, %v5402_v56  ;;  %v2555_v56 = vrot.slane %v5732_v2, 2  ;;  %v5822_v53 = vld [vmem:[%s5156_s7 + $0x60] sm:$0xff]  }
  0xce   : > { %4730 = vmatprep.mubr.msk.bf16.mxu0 %vm452_vm2, %v1824_v49  ;;  %v5830_v49 = vld [vmem:[%s5156_s7 + $0x68] sm:$0xff]   ;;  %v2569_v11 = vrot.slane %v5822_v53, 2 }
  0xcf   : > { %v2556_v4 = vsel %vm2110_vm4, %v2553_v54, %v2555_v56 }
  0xd0   : > { %v2570_v54 = vsel %vm2110_vm4, %v2567_v15, %v2569_v11 }
  0xd4   : > { %4737 = vmatmul.mubr.msk.bf16.vlgmr.msra.gmra.mxu1 %vm452_vm2, %v5409_v60  ;;  %v2557_v60 = vrot.slane %v5746_v59, 2 }
  0xd5   : > { %4731 = vmatmul.mubr.msk.bf16.gmra.mxu0 %vm452_vm2, %v1833_v1  ;;  %4811 = vmatpush3.bf16.msra.mxu1 %v3089_v48  ;;  %v2571_v1 = vrot.slane %v5830_v49, 2 }
  0xd6   : > { %4774 = vmatprep.mubr.msk.bf16.mxu0 %vm452_vm2, %v2552_v61  ;;  %4740 = vmatprep.mubr.msk.bf16.mxu1 %vm452_vm2, %v5417_v63  ;;  %v2559_v63 = vrot.slane %v5752_v58, 2  ;;  %v2558_v18 = vsel %vm2110_vm4, %v2555_v56, %v2557_v60  ;;  %v5854_v56 = vld [vmem:[%s5156_s7 + $0x70] sm:$0xff]  }
  0xd8   : > { %v2560_v46 = vsel %vm2110_vm4, %v2557_v60, %v2559_v63 }
  0xdc   : > { %4741 = vmatmul.mubr.msk.bf16.gmra.mxu1 %vm452_vm2, %v5427_v3  ;;  %v2561_v3 = vrot.slane %v5764_v14, 2 }
  0xdd   : > { %4775 = vmatmul.mubr.msk.bf16.vlgmr.msra.gmra.mxu0 %vm452_vm2, %v2554_v57  ;;  %4744 = vmatprep.mubr.msk.bf16.mxu1 %vm452_vm2, %v5435_v9 }
  0xde   : > { %4849 = vmatpush3.bf16.msra.mxu0 %v3403_v5  ;;  %4778 = vmatprep.mubr.msk.bf16.mxu0 %vm452_vm2, %v2556_v4  ;;  %v2562_v13 = vsel %vm2110_vm4, %v2559_v63, %v2561_v3  ;;  %v5862_v4 = vld [vmem:[%s5156_s7 + $0x78] sm:$0xff]   ;;  %v2573_v63 = vrot.slane %v5854_v56, 2 }
  0xe4   : > { %v5775_v52 = vpop.f32.mrf.mxu1  ;;  %4745 = vmatmul.mubr.msk.bf16.gmra.mxu1 %vm452_vm2, %v5439_v12  ;;  %v2564_v12 = vsel %vm2110_vm4, %v2561_v3, %v2563_v17  ;;  %v2575_v3 = vrot.slane %v5862_v4, 2 }
  0xe5   : > { %v5770_v33 = vpop.f32.mrf.mxu0  ;;  %4779 = vmatmul.mubr.msk.bf16.gmra.mxu0 %vm452_vm2, %v2558_v18  ;;  %4748 = vmatprep.mubr.msk.bf16.mxu1 %vm452_vm2, %v5445_v19 }
  0xe6   : > { %4782 = vmatprep.mubr.msk.bf16.mxu0 %vm452_vm2, %v2560_v46  ;;  %v5784_v38 = vpop.f32.mrf.mxu1 }
  0xe7   : > { %v5779_v9 = vpop.f32.mrf.mxu0 }
  0xe8   : > { %v5792_v7 = vpop.f32.mrf.mxu1 }
  0xe9   : > { %v5786_v0 = vpop.f32.mrf.mxu0 }
  0xea   : > { %v5800_v25 = vpop.f32.mrf.mxu1 }
  0xeb   : > { %v5794_v29 = vpop.f32.mrf.mxu0 }
  0xec   : > { %v5807_v34 = vpop.f32.mrf.mxu1  ;;  %4749 = vmatmul.mubr.msk.bf16.gmra.mxu1 %vm452_vm2, %v5450_v21  ;;  %v2568_v21 = vsel %vm2110_vm4, %v2565_v45, %v2567_v15  ;;  %v5886_v45 = vld [vmem:[%s5156_s7 + $0x80] sm:$0xff]  }
  0xed   : > { %v5802_v19 = vpop.f32.mrf.mxu0  ;;  %4783 = vmatmul.mubr.msk.bf16.gmra.mxu0 %vm452_vm2, %v2562_v13  ;;  %4752 = vmatprep.mubr.msk.bf16.mxu1 %vm452_vm2, %v5469_v31  ;;  %6566 = vst [vmem:[#allocation13_spill] sm:$0xff] %v5886_v45 }
  0xee   : > { %4786 = vmatprep.mubr.msk.bf16.mxu0 %vm452_vm2, %v2564_v12  ;;  %v5816_v35 = vpop.f32.mrf.mxu1  ;;  %v2574_v12 = vsel %vm2110_vm4, %v2571_v1, %v2573_v63 }
  0xef   : > { %v5811_v62 = vpop.f32.mrf.mxu0 }
  0xf0   : > { %v5824_v41 = vpop.f32.mrf.mxu1 }
  0xf1   : > { %v5818_v36 = vpop.f32.mrf.mxu0  ;;  %6558 = vst [vmem:[#allocation5_spill] sm:$0xff] %v5824_v41 }
  0xf2   : > { %v5832_v10 = vpop.f32.mrf.mxu1 }
  0xf3   : > { %v5826_v39 = vpop.f32.mrf.mxu0  ;;  %6559 = vst [vmem:[#allocation6_spill] sm:$0xff] %v5832_v10 }
  0xf4   : > { %v5839_v47 = vpop.f32.mrf.mxu1  ;;  %4753 = vmatmul.mubr.msk.bf16.gmra.mxu1 %vm452_vm2, %v5474_v32  ;;  %v2572_v32 = vsel %vm2110_vm4, %v2569_v11, %v2571_v1 }
  0xf5   : > { %v5834_v31 = vpop.f32.mrf.mxu0  ;;  %4787 = vmatmul.mubr.msk.bf16.gmra.mxu0 %vm452_vm2, %v2566_v28  ;;  %6560 = vst [vmem:[#allocation7_spill] sm:$0xff] %v5839_v47  ;;  %4756 = vmatprep.mubr.msk.bf16.mxu1 %vm452_vm2, %v5495_v44 }
  0xf6   : > { %4790 = vmatprep.mubr.msk.bf16.mxu0 %vm452_vm2, %v2568_v21  ;;  %v5848_v61 = vpop.f32.mrf.mxu1  ;;  %v5894_v21 = vld [vmem:[%s5156_s7 + $0x88] sm:$0xff]  }
  0xf7   : > { %v5843_v23 = vpop.f32.mrf.mxu0  ;;  %6561 = vst [vmem:[#allocation8_spill] sm:$0xff] %v5848_v61  ;;  %6568 = vst [vmem:[#allocation15_spill] sm:$0xff] %v5894_v21  ;;  %v5926_v61 = vld [vmem:[%s5156_s7 + $0x98] sm:$0xff]  }
  0xf8   : > { %v5856_v57 = vpop.f32.mrf.mxu1  ;;  %6570 = vst [vmem:[#allocation17_spill] sm:$0xff] %v5926_v61 }
  0xf9   : > { %v5850_v48 = vpop.f32.mrf.mxu0  ;;  %6562 = vst [vmem:[#allocation9_spill] sm:$0xff] %v5856_v57  ;;  %v5920_v57 = vld [vmem:[%s5156_s7 + $0x90] sm:$0xff]  }
  0xfa   : > { %v5864_v60 = vpop.f32.mrf.mxu1 }
  0xfb   : > { %v5858_v5 = vpop.f32.mrf.mxu0  ;;  %6563 = vst [vmem:[#allocation10_spill] sm:$0xff] %v5864_v60 }
  0xfc   : > { %v5871_v18 = vpop.f32.mrf.mxu1  ;;  %4757 = vmatmul.mubr.msk.bf16.gmra.mxu1 %vm452_vm2, %v5500_v50  ;;  %v2576_v50 = vsel %vm2110_vm4, %v2573_v63, %v2575_v3  ;;  %v2579_v63 = vrot.slane %v5894_v21, 2 }
  0xfd   : > { %v5866_v44 = vpop.f32.mrf.mxu0  ;;  %4791 = vmatmul.mubr.msk.bf16.gmra.mxu0 %vm452_vm2, %v2570_v54  ;;  %6564 = vst [vmem:[#allocation11_spill] sm:$0xff] %v5871_v18  ;;  %4760 = vmatprep.mubr.msk.bf16.mxu1 %vm452_vm2, %v5524_v40  ;;  %v2577_v40 = vrot.slane %v5886_v45, 2 }
  0xfe   : > { %4794 = vmatprep.mubr.msk.bf16.mxu0 %vm452_vm2, %v2572_v32  ;;  %v5880_v17 = vpop.f32.mrf.mxu1 }
  0xff   : > { %v5875_v46 = vpop.f32.mrf.mxu0  ;;  %6565 = vst [vmem:[#allocation12_spill] sm:$0xff] %v5880_v17  ;;  %v2873_v17 = vshrl.u32 %v5633_v55, 16  ;;  %v2578_v60 = vsel %vm2110_vm4, %v2575_v3, %v2577_v40 }
 0x100   : > { %v5888_v15 = vpop.f32.mrf.mxu1 }
 0x101   : > { %v5882_v13 = vpop.f32.mrf.mxu0  ;;  %6567 = vst [vmem:[#allocation14_spill] sm:$0xff] %v5888_v15  ;;  %v2868_v15 = vshll.u32 %v5719_v51, 16 }
 0x102   : > { %v5896_v11 = vpop.f32.mrf.mxu1 }
 0x103   : > { %v5890_v28 = vpop.f32.mrf.mxu0  ;;  %6569 = vst [vmem:[#allocation16_spill] sm:$0xff] %v5896_v11  ;;  %v2870_v21 = vrot.slane %v2868_v15, 3 }
 0x104   : > { %v4586_v1 = vpop.f32.mrf.mxu1  ;;  %4761 = vmatmul.mubr.msk.bf16.gmra.mxu1 %vm452_vm2, %v5530_v16  ;;  %v2876_v16 = vshll.u32 %v5633_v55, 16 }
 0x105   : > { %v5898_v54 = vpop.f32.mrf.mxu0  ;;  %4795 = vmatmul.mubr.msk.bf16.gmra.mxu0 %vm452_vm2, %v2574_v12  ;;  %v770_v26 = vadd.f32 %v4586_v1, %v5770_v33  ;;  %4764 = vmatprep.mubr.msk.bf16.mxu1 %vm452_vm2, %v5555_v42  ;;  %v2580_v42 = vsel %vm2110_vm4, %v2577_v40, %v2579_v63  ;;  %v2581_v40 = vrot.slane %v5920_v57, 2 }
 0x106   : > { %4798 = vmatprep.mubr.msk.bf16.mxu0 %vm452_vm2, %v2576_v50  ;;  %v761_v12 = vpop.f32.mrf.mxu1  ;;  %v2865_v50 = vshrl.u32 %v5719_v51, 16 }
 0x107   : > { %v5905_v32 = vpop.f32.mrf.mxu0  ;;  %v762_v18 = vadd.f32 %v761_v12, %v5779_v9  ;;  %v2875_v9 = vrot.slane %v2873_v17, 2  ;;  %v2878_v12 = vrot.slane %v2876_v16, 3 }
 0x108   : > { %v4587_v33 = vpop.f32.mrf.mxu1  ;;  %v2867_v55 = vrot.slane %v2865_v50, 2 }
 0x109   : > { %v5911_v11 = vpop.f32.mrf.mxu0  ;;  %v773_v47 = vadd.f32 %v4587_v33, %v5786_v0  ;;  %v2583_v33 = vrot.slane %v5926_v61, 2  ;;  %v2879_v16 = vor.u32 %v2878_v12, %v2875_v9 }
 0x10a   : > { %v764_v51 = vpop.f32.mrf.mxu1  ;;  %v2871_v50 = vor.u32 %v2870_v21, %v2867_v55 }
 0x10b   : > { %v5922_v1 = vpop.f32.mrf.mxu0  ;;  %v765_v3 = vadd.f32 %v764_v51, %v5794_v29  ;;  %v2885_v29 = vshll.u32 %v5638_v27, 16 }
 0x10c   : > { %v4590_v41 = vpop.f32.mrf.mxu1  ;;  %4765 = vmatmul.mubr.msk.bf16.gmra.mxu1 %vm452_vm2, %v5566_v6  ;;  %v2891_v6 = vshrl.u32 %v5732_v2, 16 }
 0x10d   : > { %v4624_v10 = vpop.f32.mrf.mxu0  ;;  %4799 = vmatmul.mubr.msk.bf16.gmra.mxu0 %vm452_vm2, %v2578_v60  ;;  %v786_v60 = vadd.f32 %v4590_v41, %v5802_v19  ;;  %4768 = vmatprep.mubr.msk.bf16.mxu1 %vm452_vm2, %v5597_v22  ;;  %v2582_v41 = vsel %vm2110_vm4, %v2579_v63, %v2581_v40  ;;  %v5001_v22 = vld [vmem:[%s5156_s7 + $0xa0] ss:$0 sps:$4 sm:$0x33]   ;;  %v2887_v9 = vrot.slane %v2885_v29, 3  ;;  %v2903_v29 = vshll.u32 %v5746_v59, 16 }
 0x10e   : > { %v5931_v45 = vadd.f32 %v4624_v10, %v770_v26  ;;  %4802 = vmatprep.mubr.msk.bf16.mxu0 %vm452_vm2, %v2580_v42  ;;  %v2882_v26 = vshrl.u32 %v5638_v27, 16  ;;  %v777_v10 = vpop.f32.mrf.mxu1  ;;  %v2894_v42 = vshll.u32 %v5732_v2, 16 }
 0x10f   : > { %v1039_v0 = vpop.f32.mrf.mxu0  ;;  %v778_v51 = vadd.f32 %v777_v10, %v5811_v62  ;;  %v2880_v62 = vsel %vm2863_vm7, %v2871_v50, %v2879_v16 }
 0x110   : > { %6571 = vst [vmem:[#allocation18_spill] sm:$0xff] %v5931_v45  ;;  %v5939_v17 = vadd.f32 %v1039_v0, %v762_v18  ;;  %v4591_v18 = vpop.f32.mrf.mxu1  ;;  %v2884_v55 = vrot.slane %v2882_v26, 2  ;;  %v2896_v63 = vrot.slane %v2894_v42, 3  ;;  %v2900_v26 = vshrl.u32 %v5746_v59, 16 }
 0x111   : > { %v4625_v15 = vpop.f32.mrf.mxu0  ;;  %v789_v45 = vadd.f32 %v4591_v18, %v5818_v36  ;;  %v2909_v42 = vshrl.u32 %v5752_v58, 16 }
 0x112   : > { %6572 = vst [vmem:[#allocation19_spill] sm:$0xff] %v5939_v17  ;;  %v5948_v19 = vadd.f32 %v4625_v15, %v773_v47  ;;  %v2584_v17 = vsel %vm2110_vm4, %v2581_v40, %v2583_v33  ;;  %v780_v12 = vpop.f32.mrf.mxu1  ;;  %v2893_v47 = vrot.slane %v2891_v6, 2  ;;  %v2585_v40 = vrot.slane %v5001_v22, 2 }
 0x113   : > { %v1042_v0 = vpop.f32.mrf.mxu0  ;;  %v781_v10 = vadd.f32 %v780_v12, %v5826_v39  ;;  %v2888_v39 = vor.u32 %v2887_v9, %v2884_v55  ;;  %v2905_v12 = vrot.slane %v2903_v29, 3 }
 0x114   : > { %v5954_v21 = vadd.f32 %v1042_v0, %v765_v3  ;;  %v4594_v36 = vpop.f32.mrf.mxu1  ;;  %4769 = vmatmul.mubr.msk.bf16.gmra.mxu1 %vm452_vm2, %v5603_v24  ;;  %v2586_v18 = vsel %vm2110_vm4, %v2583_v33, %v2585_v40 }
 0x115   : > { %v4628_v61 = vpop.f32.mrf.mxu0  ;;  %4803 = vmatmul.mubr.msk.bf16.gmra.mxu0 %vm452_vm2, %v2582_v41  ;;  %v802_v50 = vadd.f32 %v4594_v36, %v5834_v31  ;;  %4812 = vmatprep.mubr.msk.bf16.mxu1 %vm452_vm2, %v2880_v62  ;;  %v2912_v41 = vshll.u32 %v5752_v58, 16  ;;  %v2889_v9 = vsel %vm2863_vm7, %v2879_v16, %v2888_v39 }
 0x116   : > { %v5959_v15 = vadd.f32 %v4628_v61, %v786_v60  ;;  %4806 = vmatprep.mubr.msk.bf16.mxu0 %vm452_vm2, %v2584_v17  ;;  %v793_v61 = vpop.f32.mrf.mxu1  ;;  %v2897_v17 = vor.u32 %v2896_v63, %v2893_v47 }
 0x117   : > { %v1055_v3 = vpop.f32.mrf.mxu0  ;;  %v794_v24 = vadd.f32 %v793_v61, %v5843_v23  ;;  %v2914_v36 = vrot.slane %v2912_v41, 3 }
 0x118   : > { %v5967_v6 = vadd.f32 %v1055_v3, %v778_v51  ;;  %v4595_v0 = vpop.f32.mrf.mxu1  ;;  %v2902_v51 = vrot.slane %v2900_v26, 2  ;;  %v2898_v23 = vsel %vm2863_vm7, %v2888_v39, %v2897_v17  ;;  %v3316_v3 = vrot.slane %v5732_v2, 3 }
 0x119   : > { %v4629_v60 = vpop.f32.mrf.mxu0  ;;  %v805_v62 = vadd.f32 %v4595_v0, %v5850_v48  ;;  %v6573_v0 = vrot.slane %v5638_v27, 3 }
 0x11a   : > { %v5973_v22 = vadd.f32 %v4629_v60, %v789_v45  ;;  %v796_v47 = vpop.f32.mrf.mxu1  ;;  %v2911_v45 = vrot.slane %v2909_v42, 2  ;;  %v2906_v16 = vor.u32 %v2905_v12, %v2902_v51  ;;  %v2927_v60 = vshrl.u32 %v5768_v30, 16 }
 0x11b   : > { %v1058_v31 = vpop.f32.mrf.mxu0  ;;  %v797_v33 = vadd.f32 %v796_v47, %v5858_v5  ;;  %v2918_v5 = vshrl.u32 %v5764_v14, 16  ;;  %v2930_v42 = vshll.u32 %v5768_v30, 16 }
 0x11c   : > { %v5977_v55 = vadd.f32 %v1058_v31, %v781_v10  ;;  %v4598_v48 = vpop.f32.mrf.mxu1  ;;  %4813 = vmatmul.mubr.msk.bf16.vlgmr.msra.gmra.mxu1 %vm452_vm2, %v2889_v9  ;;  %v3317_v31 = vsel %vm3310_vm6, %v6573_v0, %v3316_v3 }
 0x11d   : > { %v4632_v63 = vpop.f32.mrf.mxu0  ;;  %4807 = vmatmul.mubr.msk.bf16.gmra.mxu0 %vm452_vm2, %v2586_v18  ;;  %v818_v26 = vadd.f32 %v4598_v48, %v5866_v44  ;;  %4816 = vmatprep.mubr.msk.bf16.mxu1 %vm452_vm2, %v2898_v23  ;;  %v2907_v18 = vsel %vm2863_vm7, %v2897_v17, %v2906_v16  ;;  %v2920_v9 = vrot.slane %v2918_v5, 2  ;;  %v3320_v48 = vrot.slane %v5752_v58, 3 }
 0x11e   : > { %v5983_v40 = vadd.f32 %v4632_v63, %v802_v50  ;;  %4850 = vmatprep.mubr.msk.bf16.mxu0 %vm452_vm2, %v5649_v37  ;;  %v2921_v50 = vshll.u32 %v5764_v14, 16  ;;  %v809_v39 = vpop.f32.mrf.mxu1  ;;  %v2915_v37 = vor.u32 %v2914_v36, %v2911_v45  ;;  %v2932_v45 = vrot.slane %v2930_v42, 3 }
 0x11f   : > { %v1071_v10 = vpop.f32.mrf.mxu0  ;;  %v810_v41 = vadd.f32 %v809_v39, %v5875_v46  ;;  %v2945_v39 = vshrl.u32 %v5798_v8, 16 }
 0x120   : > { %v5990_v29 = vadd.f32 %v1071_v10, %v794_v24  ;;  %v4599_v44 = vpop.f32.mrf.mxu1  ;;  %v2923_v47 = vrot.slane %v2921_v50, 3  ;;  %v2916_v46 = vsel %vm2863_vm7, %v2906_v16, %v2915_v37  ;;  %v2939_v10 = vshll.u32 %v5790_v20, 16 }
 0x121   : > { %v4633_v61 = vpop.f32.mrf.mxu0  ;;  %v821_v51 = vadd.f32 %v4599_v44, %v5882_v13  ;;  %v3318_v13 = vrot.slane %v5746_v59, 3 }
 0x122   : > { %v5998_v2 = vadd.f32 %v4633_v61, %v805_v62  ;;  %v812_v63 = vpop.f32.mrf.mxu1  ;;  %v2929_v62 = vrot.slane %v2927_v60, 2  ;;  %v2948_v61 = vshll.u32 %v5798_v8, 16 }
 0x123   : > { %v1074_v24 = vpop.f32.mrf.mxu0  ;;  %v813_v17 = vadd.f32 %v812_v63, %v5890_v28  ;;  %v2924_v28 = vor.u32 %v2923_v47, %v2920_v9  ;;  %v3319_v42 = vsel %vm3310_vm6, %v3316_v3, %v3318_v13 }
 0x124   : > { %v6005_v12 = vadd.f32 %v1074_v24, %v797_v33  ;;  %v4602_v36 = vpop.f32.mrf.mxu1  ;;  %4817 = vmatmul.mubr.msk.bf16.gmra.mxu1 %vm452_vm2, %v2907_v18  ;;  %v2933_v59 = vor.u32 %v2932_v45, %v2929_v62  ;;  %v2941_v18 = vrot.slane %v2939_v10, 3  ;;  %v2950_v3 = vrot.slane %v2948_v61, 3 }
 0x125   : > { %v4636_v23 = vpop.f32.mrf.mxu0  ;;  %4851 = vmatmul.mubr.msk.bf16.vlgmr.msra.gmra.mxu0 %vm452_vm2, %v5657_v43  ;;  %v2936_v43 = vshrl.u32 %v5790_v20, 16  ;;  %v834_v16 = vadd.f32 %v4602_v36, %v5898_v54  ;;  %4820 = vmatprep.mubr.msk.bf16.mxu1 %vm452_vm2, %v2916_v46  ;;  %v2925_v9 = vsel %vm2863_vm7, %v2915_v37, %v2924_v28  ;;  %v2954_v36 = vshrl.u32 %v5822_v53, 16 }
 0x126   : > { %v6011_v27 = vadd.f32 %v4636_v23, %v818_v26  ;;  %4854 = vmatprep.mubr.msk.bf16.mxu0 %vm452_vm2, %v3317_v31  ;;  %v825_v26 = vpop.f32.mrf.mxu1 }
 0x127   : > { %v1087_v33 = vpop.f32.mrf.mxu0  ;;  %v826_v58 = vadd.f32 %v825_v26, %v5905_v32  ;;  %v2938_v24 = vrot.slane %v2936_v43, 2  ;;  %v2934_v32 = vsel %vm2863_vm7, %v2924_v28, %v2933_v59 }
 0x128   : > { %v6020_v5 = vadd.f32 %v1087_v33, %v810_v41  ;;  %v4603_v44 = vpop.f32.mrf.mxu1  ;;  %v3321_v41 = vsel %vm3310_vm6, %v3318_v13, %v3320_v48 }
 0x129   : > { %v4637_v50 = vpop.f32.mrf.mxu0  ;;  %v837_v0 = vadd.f32 %v4603_v44, %v5911_v11  ;;  %v3322_v11 = vrot.slane %v5764_v14, 3  ;;  %v2942_v45 = vor.u32 %v2941_v18, %v2938_v24  ;;  %v2963_v14 = vshrl.u32 %v5830_v49, 16 }
 0x12a   : > { %v6026_v60 = vadd.f32 %v4637_v50, %v821_v51  ;;  %v828_v47 = vpop.f32.mrf.mxu1  ;;  %v2947_v51 = vrot.slane %v2945_v39, 2  ;;  %v2956_v44 = vrot.slane %v2954_v36, 2  ;;  %v2984_v36 = vshll.u32 %v5862_v4, 16 }
 0x12b   : > { %v1090_v54 = vpop.f32.mrf.mxu0  ;;  %v829_v23 = vadd.f32 %v828_v47, %v5922_v1  ;;  %v2957_v1 = vshll.u32 %v5822_v53, 16  ;;  %v3323_v26 = vsel %vm3310_vm6, %v3320_v48, %v3322_v11  ;;  %v2943_v39 = vsel %vm2863_vm7, %v2933_v59, %v2942_v45 }
 0x12c   : > { %v6031_v31 = vadd.f32 %v1090_v54, %v813_v17  ;;  %v4606_v62 = vpop.f32.mrf.mxu1  ;;  %4821 = vmatmul.mubr.msk.bf16.gmra.mxu1 %vm452_vm2, %v2925_v9  ;;  %v3324_v17 = vrot.slane %v5768_v30, 3  ;;  %v2951_v10 = vor.u32 %v2950_v3, %v2947_v51  ;;  %v2972_v51 = vshrl.u32 %v5854_v56, 16 }
 0x12d   : > { %v4640_v63 = vpop.f32.mrf.mxu0  ;;  %4855 = vmatmul.mubr.msk.bf16.gmra.mxu0 %vm452_vm2, %v3319_v42  ;;  %4824 = vmatprep.mubr.msk.bf16.mxu1 %vm452_vm2, %v2934_v32  ;;  %v2959_v54 = vrot.slane %v2957_v1, 3  ;;  %v3328_v32 = vrot.slane %v5798_v8, 3  ;;  %v2975_v3 = vshll.u32 %v5854_v56, 16 }
 0x12e   : > { %v6037_v46 = vadd.f32 %v4640_v63, %v834_v16  ;;  %4858 = vmatprep.mubr.msk.bf16.mxu0 %vm452_vm2, %v3321_v41  ;;  %v841_v33 = vpop.f32.mrf.mxu1  ;;  %v2966_v16 = vshll.u32 %v5830_v49, 16  ;;  %v3325_v61 = vsel %vm3310_vm6, %v3322_v11, %v3324_v17  ;;  %v2952_v18 = vsel %vm2863_vm7, %v2942_v45, %v2951_v10 }
 0x12f   : > { %v1103_v37 = vpop.f32.mrf.mxu0  ;;  %v842_v9 = vadd.f32 %v841_v33, %v5784_v38  ;;  %v2960_v38 = vor.u32 %v2959_v54, %v2956_v44  ;;  %v2981_v45 = vshrl.u32 %v5862_v4, 16 }
 0x130   : > { %v6043_v13 = vadd.f32 %v1103_v37, %v826_v58  ;;  %v4607_v30 = vpop.f32.mrf.mxu1  ;;  %v850_v58 = vadd.f32 %v4606_v62, %v5775_v52  ;;  %v2968_v48 = vrot.slane %v2966_v16, 3  ;;  %v3326_v52 = vrot.slane %v5790_v20, 3 }
 0x131   : > { %v4641_v43 = vpop.f32.mrf.mxu0  ;;  %v2974_v16 = vrot.slane %v2972_v51, 2  ;;  %v2983_v44 = vrot.slane %v2981_v45, 2 }
 0x132   : > { %v6050_v28 = vadd.f32 %v4641_v43, %v837_v0  ;;  %v844_v41 = vpop.f32.mrf.mxu1  ;;  %v2965_v0 = vrot.slane %v2963_v14, 2  ;;  %v3327_v33 = vsel %vm3310_vm6, %v3324_v17, %v3326_v52  ;;  %v3329_v14 = vsel %vm3310_vm6, %v3326_v52, %v3328_v32 }
 0x133   : > { %v1106_v50 = vpop.f32.mrf.mxu0  ;;  %v845_v8 = vadd.f32 %v844_v41, %v5800_v25  ;;  %v2986_v17 = vrot.slane %v2984_v36, 3 }
 0x134   : > { %v6056_v42 = vadd.f32 %v1106_v50, %v829_v23  ;;  %v4610_v59 = vpop.f32.mrf.mxu1  ;;  %4825 = vmatmul.mubr.msk.bf16.gmra.mxu1 %vm452_vm2, %v2943_v39  ;;  %v853_v23 = vadd.f32 %v4607_v30, %v5792_v7  ;;  %v2969_v20 = vor.u32 %v2968_v48, %v2965_v0  ;;  %v2961_v39 = vsel %vm2863_vm7, %v2951_v10, %v2960_v38  ;;  %v6574_v48 = vld [vmem:[#allocation5_spill] sm:$0xff] }
 0x135   : > { %v4644_v24 = vpop.f32.mrf.mxu0  ;;  %4859 = vmatmul.mubr.msk.bf16.gmra.mxu0 %vm452_vm2, %v3323_v26  ;;  %4828 = vmatprep.mubr.msk.bf16.mxu1 %vm452_vm2, %v2952_v18  ;;  %v2977_v26 = vrot.slane %v2975_v3, 3  ;;  %v866_v30 = vadd.f32 %v4610_v59, %v5807_v34  ;;  %v3330_v34 = vrot.slane %v5822_v53, 3  ;;  %v3332_v0 = vrot.slane %v5830_v49, 3 }
 0x136   : > { %v6061_v47 = vadd.f32 %v4644_v24, %v850_v58  ;;  %4862 = vmatprep.mubr.msk.bf16.mxu0 %vm452_vm2, %v3325_v61  ;;  %v857_v62 = vpop.f32.mrf.mxu1  ;;  %v2970_v25 = vsel %vm2863_vm7, %v2960_v38, %v2969_v20  ;;  %v2987_v53 = vor.u32 %v2986_v17, %v2983_v44  ;;  %v6579_v17 = vld [vmem:[#allocation8_spill] sm:$0xff] }
 0x137   : > { %v1119_v63 = vpop.f32.mrf.mxu0  ;;  %v858_v54 = vadd.f32 %v857_v62, %v5816_v35  ;;  %v2978_v18 = vor.u32 %v2977_v26, %v2974_v16  ;;  %v6575_v35 = vld [vmem:[#allocation13_spill] sm:$0xff]  ;;  %v3331_v36 = vsel %vm3310_vm6, %v3328_v32, %v3330_v34 }
 0x138   : > { %v6070_v11 = vadd.f32 %v1119_v63, %v842_v9  ;;  %v4611_v43 = vpop.f32.mrf.mxu1  ;;  %v2990_v59 = vshrl.u32 %v6575_v35, 16  ;;  %v2993_v63 = vshll.u32 %v6575_v35, 16 }
 0x139   : > { %v4645_v37 = vpop.f32.mrf.mxu0  ;;  %v869_v9 = vadd.f32 %v4611_v43, %v6574_v48  ;;  %v2979_v43 = vsel %vm2863_vm7, %v2969_v20, %v2978_v18  ;;  %v3334_v20 = vrot.slane %v5854_v56, 3  ;;  %v3336_v48 = vrot.slane %v5862_v4, 3  ;;  %v6582_v4 = vld [vmem:[#allocation10_spill] sm:$0xff] }
 0x13a   : > { %v6076_v1 = vadd.f32 %v4645_v37, %v853_v23  ;;  %v860_v61 = vpop.f32.mrf.mxu1  ;;  %v6576_v23 = vld [vmem:[#allocation15_spill] sm:$0xff]  ;;  %v6577_v37 = vld [vmem:[#allocation6_spill] sm:$0xff] }
 0x13b   : > { %v1122_v7 = vpop.f32.mrf.mxu0  ;;  %v2999_v38 = vshrl.u32 %v6576_v23, 16  ;;  %v3002_v62 = vshll.u32 %v6576_v23, 16  ;;  %v861_v45 = vadd.f32 %v860_v61, %v6577_v37  ;;  %v2988_v61 = vsel %vm2863_vm7, %v2978_v18, %v2987_v53  ;;  %v6581_v37 = vld [vmem:[#allocation17_spill] sm:$0xff] }
 0x13c   : > { %v6081_v50 = vadd.f32 %v1122_v7, %v845_v8  ;;  %v4614_v24 = vpop.f32.mrf.mxu1  ;;  %4829 = vmatmul.mubr.msk.bf16.gmra.mxu1 %vm452_vm2, %v2961_v39  ;;  %v3333_v7 = vsel %vm3310_vm6, %v3330_v34, %v3332_v0  ;;  %v2995_v39 = vrot.slane %v2993_v63, 3  ;;  %v3011_v18 = vshll.u32 %v5920_v57, 16 }
 0x13d   : > { %v4648_v58 = vpop.f32.mrf.mxu0  ;;  %4863 = vmatmul.mubr.msk.bf16.gmra.mxu0 %vm452_vm2, %v3327_v33  ;;  %4832 = vmatprep.mubr.msk.bf16.mxu1 %vm452_vm2, %v2970_v25  ;;  %v3001_v44 = vrot.slane %v2999_v38, 2  ;;  %v3004_v32 = vrot.slane %v3002_v62, 3 }
 0x13e   : > { %v6087_v41 = vadd.f32 %v4648_v58, %v866_v30  ;;  %4866 = vmatprep.mubr.msk.bf16.mxu0 %vm452_vm2, %v3329_v14  ;;  %v873_v51 = vpop.f32.mrf.mxu1  ;;  %v6578_v14 = vld [vmem:[#allocation7_spill] sm:$0xff]  ;;  %v2992_v30 = vrot.slane %v2990_v59, 2  ;;  %v6580_v59 = vld [vmem:[#allocation9_spill] sm:$0xff] }
 0x13f   : > { %v1135_v10 = vpop.f32.mrf.mxu0  ;;  %v882_v16 = vadd.f32 %v4614_v24, %v6578_v14  ;;  %v3005_v62 = vor.u32 %v3004_v32, %v3001_v44 }
 0x140   : > { %v6094_v52 = vadd.f32 %v1135_v10, %v858_v54  ;;  %v4615_v8 = vpop.f32.mrf.mxu1  ;;  %v874_v54 = vadd.f32 %v873_v51, %v6579_v17  ;;  %v2996_v51 = vor.u32 %v2995_v39, %v2992_v30  ;;  %v6133_v30 = vld [vmem:[%s5156_s7 + $0xa0] ss:$0 sps:$4 sm:$0x77]   ;;  %v6583_v39 = vld [vmem:[#allocation11_spill] sm:$0xff]  ;;  %s4900_s7 = smul.u32 2304, %s5110_s16  ;;  %s5004_s16 = scalar_lea.vmem %s6494_s8, 2304 }
 0x141   : > { %v4649_v3 = vpop.f32.mrf.mxu0  ;;  %v885_v63 = vadd.f32 %v4615_v8, %v6580_v59  ;;  %p5005_p11 = scmp.ne.s32.totalorder %s6494_s8, %s5004_s16  ;;  %p5012_p1 = scmp.lt.s32.totalorder %s5010_s24, %s5004_s16 }
 0x142   : > { %v6102_v49 = vadd.f32 %v4649_v3, %v869_v9  ;;  %v876_v58 = vpop.f32.mrf.mxu1  ;;  %v3008_v9 = vshrl.u32 %v5920_v57, 16  ;;  %v2997_v17 = vsel %vm2863_vm7, %v2987_v53, %v2996_v51  ;;  %s6500_s11 = scalar_lea.hbm %s6548_s3, %s4900_s7 }
 0x143   : > { %v1138_v33 = vpop.f32.mrf.mxu0  ;;  %p5006_p12 = pnand %p5005_p11, %p5127_p5  ;;  %p5013_p2 = por %p5012_p1, %p5011_p0 }
 0x144   : > { %v6108_v26 = vadd.f32 %v1138_v33, %v861_v45  ;;  %v4618_v34 = vpop.f32.mrf.mxu1  ;;  %4833 = vmatmul.mubr.msk.bf16.gmra.mxu1 %vm452_vm2, %v2979_v43  ;;  %v3017_v45 = vshrl.u32 %v6581_v37, 16  ;;  %v877_v33 = vadd.f32 %v876_v58, %v6582_v4  ;;  %v3340_v4 = vrot.slane %v6576_v23, 3 }
 0x145   : > { %v4652_v25 = vpop.f32.mrf.mxu0  ;;  %4867 = vmatmul.mubr.msk.bf16.gmra.mxu0 %vm452_vm2, %v3331_v36  ;;  %4836 = vmatprep.mubr.msk.bf16.mxu1 %vm452_vm2, %v2988_v61  ;;  %v3020_v36 = vshll.u32 %v6581_v37, 16  ;;  %v3013_v61 = vrot.slane %v3011_v18, 3  ;;  %v898_v44 = vadd.f32 %v4618_v34, %v6583_v39  ;;  %v3338_v34 = vrot.slane %v6575_v35, 3  ;;  %p5007_p13 = pneg %p5006_p12 }
 0x146   : > { %v6113_v10 = vadd.f32 %v4652_v25, %v882_v16  ;;  %4870 = vmatprep.mubr.msk.bf16.mxu0 %vm452_vm2, %v3333_v7  ;;  %v889_v38 = vpop.f32.mrf.mxu1  ;;  %v3335_v7 = vsel %vm3310_vm6, %v3332_v0, %v3334_v20  ;;  %v3337_v16 = vsel %vm3310_vm6, %v3334_v20, %v3336_v48  ;;  %v3010_v25 = vrot.slane %v3008_v9, 2 }
 0x147   : > { %v1151_v24 = vpop.f32.mrf.mxu0  ;;  %v3006_v0 = vsel %vm2863_vm7, %v2996_v51, %v3005_v62  ;;  %v3022_v59 = vrot.slane %v3020_v36, 3  ;;  %v6585_v51 = vld [vmem:[#allocation14_spill] sm:$0xff]  ;;  %p5014_p3 = pnand %p5013_p2, %p5007_p13 }
 0x148   : > { %v6122_v3 = vadd.f32 %v1151_v24, %v874_v54  ;;  %v4619_v8 = vpop.f32.mrf.mxu1  ;;  %v3019_v24 = vrot.slane %v3017_v45, 2  ;;  %v6586_v36 = vld [vmem:[#allocation18_spill] sm:$0xff] }
 0x149   : > { %v4653_v56 = vpop.f32.mrf.mxu0  ;;  %v901_v45 = vadd.f32 %v4619_v8, %v6585_v51 }
 0x14a   : > { %v6128_v43 = vadd.f32 %v4653_v56, %v885_v63  ;;  %v892_v54 = vpop.f32.mrf.mxu1  ;;  %v6584_v63 = vld [vmem:[#allocation12_spill] sm:$0xff]  ;;  %v3014_v56 = vor.u32 %v3013_v61, %v3010_v25  ;;  %v3023_v39 = vor.u32 %v3022_v59, %v3019_v24  ;;  %v6588_v25 = vld [vmem:[#allocation19_spill] sm:$0xff] }
 0x14b   : > { %v1154_v14 = vpop.f32.mrf.mxu0  ;;  %v890_v20 = vadd.f32 %v889_v38, %v6584_v63 }
 0x14c   : > { %v6136_v32 = vadd.f32 %v1154_v14, %v877_v33  ;;  %v4662_v18 = vpop.f32.mrf.mxu1  ;;  %4837 = vmatmul.mubr.msk.bf16.gmra.mxu1 %vm452_vm2, %v2997_v17  ;;  %v3026_v33 = vshrl.u32 %v6133_v30, 16  ;;  %v3029_v14 = vshll.u32 %v6133_v30, 16 }
 0x14d   : > { %v4656_v58 = vpop.f32.mrf.mxu0  ;;  %4871 = vmatmul.mubr.msk.bf16.gmra.mxu0 %vm452_vm2, %v3335_v7  ;;  %v1623_v7 = vadd.f32 %v4662_v18, %v6586_v36  ;;  %4840 = vmatprep.mubr.msk.bf16.mxu1 %vm452_vm2, %v3006_v0  ;;  %v3341_v18 = vsel %vm3310_vm6, %v3338_v34, %v3340_v4 }
 0x14e   : > { %v6142_v9 = vadd.f32 %v4656_v58, %v898_v44  ;;  %4874 = vmatprep.mubr.msk.bf16.mxu0 %vm452_vm2, %v3337_v16  ;;  %v1478_v35 = vpop.f32.mrf.mxu1  ;;  %v6587_v44 = vld [vmem:[#allocation16_spill] sm:$0xff]  ;;  %v3339_v58 = vsel %vm3310_vm6, %v3336_v48, %v3338_v34  ;;  %v3028_v51 = vrot.slane %v3026_v33, 2  ;;  %v3031_v24 = vrot.slane %v3029_v14, 3 }
 0x14f   : > { %v1167_v53 = vpop.f32.mrf.mxu0  ;;  %v893_v17 = vadd.f32 %v892_v54, %v6587_v44  ;;  %v1621_v61 = vadd.f32 %v1478_v35, %v6588_v25  ;;  %v3344_v33 = vrot.slane %v6581_v37, 3 }
 0x150   : > { %v6151_v38 = vadd.f32 %v1167_v53, %v890_v20  ;;  %v4663_v8 = vpop.f32.mrf.mxu1  ;;  %v3015_v20 = vsel %vm2863_vm7, %v3005_v62, %v3014_v56  ;;  %v3342_v62 = vrot.slane %v5920_v57, 3 }
 0x151   : > { %v4657_v16 = vpop.f32.mrf.mxu0  ;;  %v1624_v0 = vadd.f32 %v4663_v8, %v5948_v19 }
 0x152   : > { %v6157_v23 = vadd.f32 %v4657_v16, %v901_v45  ;;  %v1481_v59 = vpop.f32.mrf.mxu1  ;;  %v3024_v45 = vsel %vm2863_vm7, %v3014_v56, %v3023_v39  ;;  %v3032_v56 = vor.u32 %v3031_v24, %v3028_v51  ;;  %v3343_v57 = vsel %vm3310_vm6, %v3340_v4, %v3342_v62 }
 0x153   : > { %v1170_v63 = vpop.f32.mrf.mxu0  ;;  %v1622_v48 = vadd.f32 %v1481_v59, %v5954_v21  ;;  %v3346_v4 = vrot.slane %v6133_v30, 3 }
 0x154   : > { %v6163_v53 = vadd.f32 %v1170_v63, %v893_v17  ;;  %v4666_v34 = vpop.f32.mrf.mxu1  ;;  %4841 = vmatmul.mubr.msk.bf16.gmra.mxu1 %vm452_vm2, %v3015_v20 }
 0x155   : > { %v4700_v54 = vpop.f32.mrf.mxu0  ;;  %4875 = vmatmul.mubr.msk.bf16.gmra.mxu0 %vm452_vm2, %v3339_v58  ;;  %v1627_v14 = vadd.f32 %v4666_v34, %v5959_v15  ;;  %4844 = vmatprep.mubr.msk.bf16.mxu1 %vm452_vm2, %v3024_v45  ;;  %v3345_v58 = vsel %vm3310_vm6, %v3342_v62, %v3344_v33 }
 0x156   : > { %v6168_v36 = vadd.f32 %v4700_v54, %v1623_v7  ;;  %4878 = vmatprep.mubr.msk.bf16.mxu0 %vm452_vm2, %v3341_v18  ;;  %v1494_v21 = vpop.f32.mrf.mxu1 }
 0x157   : > { %v1925_v19 = vpop.f32.mrf.mxu0  ;;  %v1625_v16 = vadd.f32 %v1494_v21, %v5967_v6 }
 0x158   : > { %v6175_v35 = vadd.f32 %v1925_v19, %v1621_v61  ;;  %v4667_v17 = vpop.f32.mrf.mxu1  ;;  %v3033_v61 = vsel %vm2863_vm7, %v3023_v39, %v3032_v56 }
 0x159   : > { %v4701_v7 = vpop.f32.mrf.mxu0  ;;  %v1628_v37 = vadd.f32 %v4667_v17, %v5973_v22 }
 0x15a   : > { %v6179_v44 = vadd.f32 %v4701_v7, %v1624_v0  ;;  %v1497_v8 = vpop.f32.mrf.mxu1 }
 0x15b   : > { %v1928_v25 = vpop.f32.mrf.mxu0  ;;  %v1626_v6 = vadd.f32 %v1497_v8, %v5977_v55  ;;  %v3347_v55 = vsel %vm3310_vm6, %v3344_v33, %v3346_v4 }
 0x15c   : > { %v6184_v15 = vadd.f32 %v1928_v25, %v1622_v48  ;;  %v4670_v18 = vpop.f32.mrf.mxu1  ;;  %4845 = vmatmul.mubr.msk.bf16.gmra.mxu1 %vm452_vm2, %v3033_v61 }
 0x15d   : > { %v4704_v63 = vpop.f32.mrf.mxu0  ;;  %4879 = vmatmul.mubr.msk.bf16.gmra.mxu0 %vm452_vm2, %v3343_v57  ;;  %v1631_v0 = vadd.f32 %v4670_v18, %v5983_v40 }
 0x15e   : > { %v6189_v20 = vadd.f32 %v4704_v63, %v1627_v14  ;;  %4882 = vmatprep.mubr.msk.bf16.mxu0 %vm452_vm2, %v3345_v58  ;;  %v1510_v39 = vpop.f32.mrf.mxu1 }
 0x15f   : > { %v1941_v22 = vpop.f32.mrf.mxu0  ;;  %v1629_v59 = vadd.f32 %v1510_v39, %v5990_v29 }
 0x160   : > { %v6195_v51 = vadd.f32 %v1941_v22, %v1625_v16  ;;  %v4671_v45 = vpop.f32.mrf.mxu1 }
 0x161   : > { %v4705_v24 = vpop.f32.mrf.mxu0  ;;  %v1632_v30 = vadd.f32 %v4671_v45, %v5998_v2 }
 0x162   : > { %v6198_v54 = vadd.f32 %v4705_v24, %v1628_v37  ;;  %v1513_v34 = vpop.f32.mrf.mxu1 }
 0x163   : > { %v1944_v48 = vpop.f32.mrf.mxu0  ;;  %v1630_v40 = vadd.f32 %v1513_v34, %v6005_v12 }
 0x164   : > { %v6202_v62 = vadd.f32 %v1944_v48, %v1626_v6  ;;  %v4674_v56 = vpop.f32.mrf.mxu1 }
 0x165   : > { %v4708_v19 = vpop.f32.mrf.mxu0  ;;  %4883 = vmatmul.mubr.msk.bf16.gmra.mxu0 %vm452_vm2, %v3347_v55  ;;  %v1635_v21 = vadd.f32 %v4674_v56, %v6011_v27 }
 0x166   : > { %v6206_v14 = vadd.f32 %v4708_v19, %v1631_v0  ;;  %v1526_v33 = vpop.f32.mrf.mxu1 }
 0x167   : > { %v1957_v29 = vpop.f32.mrf.mxu0  ;;  %v1633_v2 = vadd.f32 %v1526_v33, %v6020_v5 }
 0x168   : > { %v6209_v7 = vadd.f32 %v1957_v29, %v1629_v59  ;;  %v4675_v17 = vpop.f32.mrf.mxu1 }
 0x169   : > { %v4709_v16 = vpop.f32.mrf.mxu0  ;;  %v1636_v58 = vadd.f32 %v4675_v17, %v6026_v60 }
 0x16a   : > { %v6212_v57 = vadd.f32 %v4709_v16, %v1632_v30  ;;  %v1529_v12 = vpop.f32.mrf.mxu1 }
 0x16b   : > { %v1960_v25 = vpop.f32.mrf.mxu0  ;;  %v1634_v8 = vadd.f32 %v1529_v12, %v6031_v31 }
 0x16c   : > { %v6215_v37 = vadd.f32 %v1960_v25, %v1630_v40  ;;  %v4678_v27 = vpop.f32.mrf.mxu1 }
 0x16d   : > { %v4712_v61 = vpop.f32.mrf.mxu0  ;;  %v1639_v4 = vadd.f32 %v4678_v27, %v6037_v46 }
 0x16e   : > { %v6218_v63 = vadd.f32 %v4712_v61, %v1635_v21  ;;  %v1542_v5 = vpop.f32.mrf.mxu1 }
 0x16f   : > { %v1973_v6 = vpop.f32.mrf.mxu0  ;;  %v1637_v0 = vadd.f32 %v1542_v5, %v6043_v13 }
 0x170   : > { %v6221_v18 = vadd.f32 %v1973_v6, %v1633_v2  ;;  %v4679_v60 = vpop.f32.mrf.mxu1 }
 0x171   : > { %v4713_v22 = vpop.f32.mrf.mxu0  ;;  %v1640_v59 = vadd.f32 %v4679_v60, %v6050_v28 }
 0x172   : > { %v6224_v39 = vadd.f32 %v4713_v22, %v1636_v58  ;;  %v1545_v31 = vpop.f32.mrf.mxu1 }
 0x173   : > { %v1976_v24 = vpop.f32.mrf.mxu0  ;;  %v1638_v48 = vadd.f32 %v1545_v31, %v6056_v42 }
 0x174   : > { %v6227_v55 = vadd.f32 %v1976_v24, %v1634_v8  ;;  %v4682_v46 = vpop.f32.mrf.mxu1 }
 0x175   : > { %v4716_v45 = vpop.f32.mrf.mxu0  ;;  %v1643_v19 = vadd.f32 %v4682_v46, %v6061_v47 }
 0x176   : > { %v6230_v30 = vadd.f32 %v4716_v45, %v1639_v4  ;;  %v1558_v13 = vpop.f32.mrf.mxu1 }
 0x177   : > { %v1989_v34 = vpop.f32.mrf.mxu0  ;;  %v1641_v29 = vadd.f32 %v1558_v13, %v6070_v11 }
 0x178   : > { %v6233_v40 = vadd.f32 %v1989_v34, %v1637_v0  ;;  %v4683_v28 = vpop.f32.mrf.mxu1 }
 0x179   : > { %v4717_v56 = vpop.f32.mrf.mxu0  ;;  %v1644_v16 = vadd.f32 %v4683_v28, %v6076_v1 }
 0x17a   : > { %v6236_v21 = vadd.f32 %v4717_v56, %v1640_v59  ;;  %v1561_v42 = vpop.f32.mrf.mxu1 }
 0x17b   : > { %v1992_v33 = vpop.f32.mrf.mxu0  ;;  %v1642_v25 = vadd.f32 %v1561_v42, %v6081_v50 }
 0x17c   : > { %v6239_v2 = vadd.f32 %v1992_v33, %v1638_v48  ;;  %v4686_v47 = vpop.f32.mrf.mxu1 }
 0x17d   : > { %v4720_v17 = vpop.f32.mrf.mxu0  ;;  %v1647_v61 = vadd.f32 %v4686_v47, %v6087_v41 }
 0x17e   : > { %v6242_v58 = vadd.f32 %v4720_v17, %v1643_v19  ;;  %v1574_v11 = vpop.f32.mrf.mxu1 }
 0x17f   : > { %v2005_v12 = vpop.f32.mrf.mxu0  ;;  %v1645_v6 = vadd.f32 %v1574_v11, %v6094_v52 }
 0x180   : > { %v6245_v8 = vadd.f32 %v2005_v12, %v1641_v29  ;;  %v4687_v1 = vpop.f32.mrf.mxu1 }
 0x181   : > { %v4721_v27 = vpop.f32.mrf.mxu0  ;;  %v1648_v22 = vadd.f32 %v4687_v1, %v6102_v49 }
 0x182   : > { %v6248_v4 = vadd.f32 %v4721_v27, %v1644_v16  ;;  %v1577_v50 = vpop.f32.mrf.mxu1 }
 0x183   : > { %v2008_v5 = vpop.f32.mrf.mxu0  ;;  %v1646_v24 = vadd.f32 %v1577_v50, %v6108_v26 }
 0x184   : > { %v6251_v0 = vadd.f32 %v2008_v5, %v1642_v25  ;;  %v4690_v41 = vpop.f32.mrf.mxu1 }
 0x185   : > { %v4724_v60 = vpop.f32.mrf.mxu0  ;;  %v1651_v45 = vadd.f32 %v4690_v41, %v6113_v10 }
 0x186   : > { %v6254_v59 = vadd.f32 %v4724_v60, %v1647_v61  ;;  %v1590_v52 = vpop.f32.mrf.mxu1 }
 0x187   : > { %v2021_v31 = vpop.f32.mrf.mxu0  ;;  %v1649_v34 = vadd.f32 %v1590_v52, %v6122_v3 }
 0x188   : > { %v6257_v48 = vadd.f32 %v2021_v31, %v1645_v6  ;;  %v4691_v49 = vpop.f32.mrf.mxu1 }
 0x189   : > { %v4725_v46 = vpop.f32.mrf.mxu0  ;;  %v1652_v56 = vadd.f32 %v4691_v49, %v6128_v43 }
 0x18a   : > { %v6260_v19 = vadd.f32 %v4725_v46, %v1648_v22  ;;  %v1593_v26 = vpop.f32.mrf.mxu1 }
 0x18b   : > { %v2024_v13 = vpop.f32.mrf.mxu0  ;;  %v1650_v33 = vadd.f32 %v1593_v26, %v6136_v32 }
 0x18c   : > { %v6263_v29 = vadd.f32 %v2024_v13, %v1646_v24  ;;  %v4694_v10 = vpop.f32.mrf.mxu1 }
 0x18d   : > { %v4728_v28 = vpop.f32.mrf.mxu0  ;;  %v1655_v17 = vadd.f32 %v4694_v10, %v6142_v9 }
 0x18e   : > { %v6266_v16 = vadd.f32 %v4728_v28, %v1651_v45  ;;  %v1606_v3 = vpop.f32.mrf.mxu1 }
 0x18f   : > { %v2037_v42 = vpop.f32.mrf.mxu0  ;;  %v1653_v12 = vadd.f32 %v1606_v3, %v6151_v38 }
 0x190   : > { %v6269_v25 = vadd.f32 %v2037_v42, %v1649_v34  ;;  %v4695_v43 = vpop.f32.mrf.mxu1 }
 0x191   : > { %v4729_v47 = vpop.f32.mrf.mxu0  ;;  %v1656_v27 = vadd.f32 %v4695_v43, %v6157_v23 }
 0x192   : > { %v6272_v61 = vadd.f32 %v4729_v47, %v1652_v56  ;;  %v1609_v32 = vpop.f32.mrf.mxu1 }
 0x193   : > { %v2040_v11 = vpop.f32.mrf.mxu0  ;;  %v1654_v5 = vadd.f32 %v1609_v32, %v6163_v53 }
 0x194   : > { %v6275_v6 = vadd.f32 %v2040_v11, %v1650_v33  ;;  %v4738_v9 = vpop.f32.mrf.mxu1 }
 0x195   : > { %v4732_v1 = vpop.f32.mrf.mxu0  ;;  %v2384_v60 = vadd.f32 %v4738_v9, %v6168_v36 }
 0x196   : > { %v6278_v22 = vadd.f32 %v4732_v1, %v1655_v17  ;;  %v2239_v38 = vpop.f32.mrf.mxu1 }
 0x197   : > { %v2053_v50 = vpop.f32.mrf.mxu0  ;;  %v2382_v31 = vadd.f32 %v2239_v38, %v6175_v35 }
 0x198   : > { %v6281_v24 = vadd.f32 %v2053_v50, %v1653_v12  ;;  %v4739_v23 = vpop.f32.mrf.mxu1 }
 0x199   : > { %v4733_v41 = vpop.f32.mrf.mxu0  ;;  %v2385_v46 = vadd.f32 %v4739_v23, %v6179_v44 }
 0x19a   : > { %v6284_v45 = vadd.f32 %v4733_v41, %v1656_v27  ;;  %v2242_v53 = vpop.f32.mrf.mxu1 }
 0x19b   : > { %v2056_v52 = vpop.f32.mrf.mxu0  ;;  %v2383_v13 = vadd.f32 %v2242_v53, %v6184_v15 }
 0x19c   : > { %v6287_v34 = vadd.f32 %v2056_v52, %v1654_v5  ;;  %v4742_v36 = vpop.f32.mrf.mxu1 }
 0x19d   : > { %v4776_v49 = vpop.f32.mrf.mxu0  ;;  %v2388_v28 = vadd.f32 %v4742_v36, %v6189_v20 }
 0x19e   : > { %v6290_v56 = vadd.f32 %v4776_v49, %v2384_v60  ;;  %v2255_v35 = vpop.f32.mrf.mxu1 }
 0x19f   : > { %v2678_v26 = vpop.f32.mrf.mxu0  ;;  %v2386_v42 = vadd.f32 %v2255_v35, %v6195_v51 }
 0x1a0   : > { %v6293_v33 = vadd.f32 %v2678_v26, %v2382_v31  ;;  %v4743_v44 = vpop.f32.mrf.mxu1 }
 0x1a1   : > { %v4777_v10 = vpop.f32.mrf.mxu0  ;;  %v2389_v47 = vadd.f32 %v4743_v44, %v6198_v54 }
 0x1a2   : > { %v6296_v17 = vadd.f32 %v4777_v10, %v2385_v46  ;;  %v2258_v15 = vpop.f32.mrf.mxu1 }
 0x1a3   : > { %v2681_v3 = vpop.f32.mrf.mxu0  ;;  %v2387_v11 = vadd.f32 %v2258_v15, %v6202_v62 }
 0x1a4   : > { %v6299_v12 = vadd.f32 %v2681_v3, %v2383_v13  ;;  %v4746_v20 = vpop.f32.mrf.mxu1 }
 0x1a5   : > { %v4780_v43 = vpop.f32.mrf.mxu0  ;;  %v2392_v1 = vadd.f32 %v4746_v20, %v6206_v14 }
 0x1a6   : > { %v6302_v27 = vadd.f32 %v4780_v43, %v2388_v28  ;;  %v2271_v51 = vpop.f32.mrf.mxu1 }
 0x1a7   : > { %v2694_v32 = vpop.f32.mrf.mxu0  ;;  %v2390_v50 = vadd.f32 %v2271_v51, %v6209_v7 }
 0x1a8   : > { %v6305_v5 = vadd.f32 %v2694_v32, %v2386_v42  ;;  %v4747_v54 = vpop.f32.mrf.mxu1 }
 0x1a9   : > { %v4781_v9 = vpop.f32.mrf.mxu0  ;;  %v2393_v41 = vadd.f32 %v4747_v54, %v6212_v57 }
 0x1aa   : > { %v6308_v60 = vadd.f32 %v4781_v9, %v2389_v47  ;;  %v2274_v62 = vpop.f32.mrf.mxu1 }
 0x1ab   : > { %v2697_v38 = vpop.f32.mrf.mxu0  ;;  %v2391_v52 = vadd.f32 %v2274_v62, %v6215_v37 }
 0x1ac   : > { %v6311_v31 = vadd.f32 %v2697_v38, %v2387_v11  ;;  %v4750_v14 = vpop.f32.mrf.mxu1 }
 0x1ad   : > { %v4784_v23 = vpop.f32.mrf.mxu0  ;;  %v2396_v49 = vadd.f32 %v4750_v14, %v6218_v63 }
 0x1ae   : > { %v6314_v46 = vadd.f32 %v4784_v23, %v2392_v1  ;;  %v2287_v7 = vpop.f32.mrf.mxu1 }
 0x1af   : > { %v2710_v53 = vpop.f32.mrf.mxu0  ;;  %v2394_v26 = vadd.f32 %v2287_v7, %v6221_v18 }
 0x1b0   : > { %v6317_v13 = vadd.f32 %v2710_v53, %v2390_v50  ;;  %v4751_v57 = vpop.f32.mrf.mxu1 }
 0x1b1   : > { %v4785_v36 = vpop.f32.mrf.mxu0  ;;  %v2397_v10 = vadd.f32 %v4751_v57, %v6224_v39 }
 0x1b2   : > { %v6320_v28 = vadd.f32 %v4785_v36, %v2393_v41  ;;  %v2290_v37 = vpop.f32.mrf.mxu1 }
 0x1b3   : > { %v2713_v35 = vpop.f32.mrf.mxu0  ;;  %v2395_v3 = vadd.f32 %v2290_v37, %v6227_v55 }
 0x1b4   : > { %v6323_v42 = vadd.f32 %v2713_v35, %v2391_v52  ;;  %v4754_v63 = vpop.f32.mrf.mxu1 }
 0x1b5   : > { %v4788_v44 = vpop.f32.mrf.mxu0  ;;  %v2400_v43 = vadd.f32 %v4754_v63, %v6230_v30 }
 0x1b6   : > { %v6326_v47 = vadd.f32 %v4788_v44, %v2396_v49  ;;  %v2303_v18 = vpop.f32.mrf.mxu1 }
 0x1b7   : > { %v2726_v15 = vpop.f32.mrf.mxu0  ;;  %v2398_v32 = vadd.f32 %v2303_v18, %v6233_v40 }
 0x1b8   : > { %v6329_v11 = vadd.f32 %v2726_v15, %v2394_v26  ;;  %v4755_v39 = vpop.f32.mrf.mxu1 }
 0x1b9   : > { %v4789_v20 = vpop.f32.mrf.mxu0  ;;  %v2401_v9 = vadd.f32 %v4755_v39, %v6236_v21 }
 0x1ba   : > { %v6332_v1 = vadd.f32 %v4789_v20, %v2397_v10  ;;  %v2306_v55 = vpop.f32.mrf.mxu1 }
 0x1bb   : > { %v2729_v51 = vpop.f32.mrf.mxu0  ;;  %v2399_v38 = vadd.f32 %v2306_v55, %v6239_v2 }
 0x1bc   : > { %v6335_v50 = vadd.f32 %v2729_v51, %v2395_v3  ;;  %v4758_v30 = vpop.f32.mrf.mxu1 }
 0x1bd   : > { %v4792_v54 = vpop.f32.mrf.mxu0  ;;  %v2404_v23 = vadd.f32 %v4758_v30, %v6242_v58 }
 0x1be   : > { %v6338_v41 = vadd.f32 %v4792_v54, %v2400_v43  ;;  %v2319_v40 = vpop.f32.mrf.mxu1 }
 0x1bf   : > { %v2742_v62 = vpop.f32.mrf.mxu0  ;;  %v2402_v53 = vadd.f32 %v2319_v40, %v6245_v8 }
 0x1c0   : > { %v6341_v52 = vadd.f32 %v2742_v62, %v2398_v32  ;;  %v4759_v21 = vpop.f32.mrf.mxu1 }
 0x1c1   : > { %v4793_v14 = vpop.f32.mrf.mxu0  ;;  %v2405_v36 = vadd.f32 %v4759_v21, %v6248_v4 }
 0x1c2   : > { %v6344_v49 = vadd.f32 %v4793_v14, %v2401_v9  ;;  %v2322_v2 = vpop.f32.mrf.mxu1 }
 0x1c3   : > { %v2745_v7 = vpop.f32.mrf.mxu0  ;;  %v2403_v35 = vadd.f32 %v2322_v2, %v6251_v0 }
 0x1c4   : > { %v6347_v26 = vadd.f32 %v2745_v7, %v2399_v38  ;;  %v4762_v58 = vpop.f32.mrf.mxu1 }
 0x1c5   : > { %v4796_v57 = vpop.f32.mrf.mxu0  ;;  %v2408_v44 = vadd.f32 %v4762_v58, %v6254_v59 }
 0x1c6   : > { %v6350_v10 = vadd.f32 %v4796_v57, %v2404_v23  ;;  %v2335_v8 = vpop.f32.mrf.mxu1 }
 0x1c7   : > { %v2758_v37 = vpop.f32.mrf.mxu0  ;;  %v2406_v15 = vadd.f32 %v2335_v8, %v6257_v48 }
 0x1c8   : > { %v6353_v3 = vadd.f32 %v2758_v37, %v2402_v53  ;;  %v4763_v4 = vpop.f32.mrf.mxu1 }
 0x1c9   : > { %v4797_v63 = vpop.f32.mrf.mxu0  ;;  %v2409_v20 = vadd.f32 %v4763_v4, %v6260_v19 }
 0x1ca   : > { %v6356_v43 = vadd.f32 %v4797_v63, %v2405_v36  ;;  %v2338_v0 = vpop.f32.mrf.mxu1 }
 0x1cb   : > { %v2761_v18 = vpop.f32.mrf.mxu0  ;;  %v2407_v51 = vadd.f32 %v2338_v0, %v6263_v29 }
 0x1cc   : > { %v6359_v32 = vadd.f32 %v2761_v18, %v2403_v35  ;;  %v4766_v59 = vpop.f32.mrf.mxu1 }
 0x1cd   : > { %v4800_v39 = vpop.f32.mrf.mxu0  ;;  %v2412_v54 = vadd.f32 %v4766_v59, %v6266_v16 }
 0x1ce   : > { %v6362_v9 = vadd.f32 %v4800_v39, %v2408_v44  ;;  %v2351_v48 = vpop.f32.mrf.mxu1 }
 0x1cf   : > { %v2774_v55 = vpop.f32.mrf.mxu0  ;;  %v2410_v62 = vadd.f32 %v2351_v48, %v6269_v25 }
 0x1d0   : > { %v6365_v38 = vadd.f32 %v2774_v55, %v2406_v15  ;;  %v4767_v19 = vpop.f32.mrf.mxu1 }
 0x1d1   : > { %v4801_v30 = vpop.f32.mrf.mxu0  ;;  %v2413_v14 = vadd.f32 %v4767_v19, %v6272_v61 }
 0x1d2   : > { %v6368_v23 = vadd.f32 %v4801_v30, %v2409_v20  ;;  %v2354_v29 = vpop.f32.mrf.mxu1 }
 0x1d3   : > { %v2777_v40 = vpop.f32.mrf.mxu0  ;;  %v2411_v7 = vadd.f32 %v2354_v29, %v6275_v6 }
 0x1d4   : > { %v6371_v53 = vadd.f32 %v2777_v40, %v2407_v51  ;;  %v4770_v16 = vpop.f32.mrf.mxu1 }
 0x1d5   : > { %v4804_v21 = vpop.f32.mrf.mxu0  ;;  %v2416_v57 = vadd.f32 %v4770_v16, %v6278_v22 }
 0x1d6   : > { %v6374_v36 = vadd.f32 %v4804_v21, %v2412_v54  ;;  %v2367_v25 = vpop.f32.mrf.mxu1 }
 0x1d7   : > { %v2790_v2 = vpop.f32.mrf.mxu0  ;;  %v2414_v37 = vadd.f32 %v2367_v25, %v6281_v24 }
 0x1d8   : > { %v6377_v35 = vadd.f32 %v2790_v2, %v2410_v62  ;;  %v4771_v61 = vpop.f32.mrf.mxu1 }
 0x1d9   : > { %v4805_v58 = vpop.f32.mrf.mxu0  ;;  %v2417_v63 = vadd.f32 %v4771_v61, %v6284_v45 }
 0x1da   : > { %v6380_v44 = vadd.f32 %v4805_v58, %v2413_v14  ;;  %v2370_v6 = vpop.f32.mrf.mxu1  ;;  %v6399_v14 = vld [vmem:[%s6547_s2] ss:$0 sm:$0xff] }
 0x1db   : > { %v2793_v8 = vpop.f32.mrf.mxu0  ;;  %v2415_v18 = vadd.f32 %v2370_v6, %v6287_v34 }
 0x1dc   : > { %v6383_v15 = vadd.f32 %v2793_v8, %v2411_v7  ;;  %v4814_v22 = vpop.f32.mrf.mxu1 }
 0x1dd   : > { %v4808_v4 = vpop.f32.mrf.mxu0  ;;  %v3270_v45 = vadd.f32 %v4814_v22, %v6290_v56 }
 0x1de   : > { %v6386_v20 = vadd.f32 %v4808_v4, %v2416_v57  ;;  %v3125_v51 = vpop.f32.mrf.mxu1 }
 0x1df   : > { %v2806_v0 = vpop.f32.mrf.mxu0  ;;  %v3268_v62 = vadd.f32 %v3125_v51, %v6293_v33 }
 0x1e0   : > { %v6388_v39 = vadd.f32 %v2806_v0, %v2414_v37  ;;  %v4815_v55 = vpop.f32.mrf.mxu1 }
 0x1e1   : > { %v4809_v24 = vpop.f32.mrf.mxu0  ;;  %v3271_v21 = vadd.f32 %v4815_v55, %v6296_v17 }
 0x1e2   : > { %v6390_v59 = vadd.f32 %v4809_v24, %v2417_v63  ;;  %v3128_v30 = vpop.f32.mrf.mxu1 }
 0x1e3   : > { %v2809_v54 = vpop.f32.mrf.mxu0  ;;  %v3269_v2 = vadd.f32 %v3128_v30, %v6299_v12 }
 0x1e4   : > { %v6393_v48 = vadd.f32 %v2809_v54, %v2415_v18  ;;  %v4818_v40 = vpop.f32.mrf.mxu1 }
 0x1e5   : > { %v4852_v34 = vpop.f32.mrf.mxu0  ;;  %v3274_v37 = vadd.f32 %v4818_v40, %v6302_v27 }
 0x1e6   : > { %v3584_v19 = vadd.f32 %v4852_v34, %v3270_v45  ;;  %v3141_v56 = vpop.f32.mrf.mxu1 }
 0x1e7   : > { %v3439_v29 = vpop.f32.mrf.mxu0  ;;  %v3272_v0 = vadd.f32 %v3141_v56, %v6305_v5 }
 0x1e8   : > { %v3582_v7 = vadd.f32 %v3439_v29, %v3268_v62  ;;  %v3627_v57 = vadd.f32 %v6399_v14, %v3584_v19  ;;  %v4819_v33 = vpop.f32.mrf.mxu1 }
 0x1e9   : > { %v4853_v16 = vpop.f32.mrf.mxu0  ;;  %v3275_v54 = vadd.f32 %v4819_v33, %v6308_v60 }
 0x1ea   : > { %v3585_v25 = vadd.f32 %v4853_v16, %v3271_v21  ;;  %v3625_v61 = vadd.f32 %v6399_v14, %v3582_v7  ;;  %v3144_v63 = vpop.f32.mrf.mxu1  ;;  %v3663_v4 = vmax.f32 %v3627_v57, 0.0 }
 0x1eb   : > { %v3442_v58 = vpop.f32.mrf.mxu0  ;;  %v3273_v19 = vadd.f32 %v3144_v63, %v6311_v31 }
 0x1ec   : > { %v3628_v8 = vadd.f32 %v6399_v14, %v3585_v25  ;;  %v3583_v17 = vadd.f32 %v3442_v58, %v3269_v2  ;;  %v4822_v51 = vpop.f32.mrf.mxu1  ;;  %v3661_v55 = vmax.f32 %v3625_v61, 0.0 }
 0x1ed   : > { %v4856_v6 = vpop.f32.mrf.mxu0  ;;  %v3278_v60 = vadd.f32 %v4822_v51, %v6314_v46 }
 0x1ee   : > { %v3664_v18 = vmax.f32 %v3628_v8, 0.0  ;;  %v3626_v12 = vadd.f32 %v6399_v14, %v3583_v17  ;;  %v3588_v22 = vadd.f32 %v4856_v6, %v3274_v37  ;;  %v3157_v30 = vpop.f32.mrf.mxu1 }
 0x1ef   : > { %v3455_v24 = vpop.f32.mrf.mxu0  ;;  %v3276_v61 = vadd.f32 %v3157_v30, %v6317_v13 }
 0x1f0   : > { %v4274_v27 = vpack.c.bf16 %v3664_v18, %v3663_v4  ;;  %v3662_v45 = vmax.f32 %v3626_v12, 0.0  ;;  %v3586_v34 = vadd.f32 %v3455_v24, %v3272_v0  ;;  %v3631_v5 = vadd.f32 %v6399_v14, %v3588_v22  ;;  %v4823_v21 = vpop.f32.mrf.mxu1 }
 0x1f1   : > { %v4857_v62 = vpop.f32.mrf.mxu0  ;;  %v3279_v46 = vadd.f32 %v4823_v21, %v6320_v28 }
 0x1f2   : > { %4356 = vst [vmem:[%s6413_s6 + $0x8] sm:$0xff] %v4274_v27   ;;  %v4269_v40 = vpack.c.bf16 %v3662_v45, %v3661_v55  ;;  %v3589_v29 = vadd.f32 %v4857_v62, %v3275_v54  ;;  %v3629_v56 = vadd.f32 %v6399_v14, %v3586_v34  ;;  %v3160_v57 = vpop.f32.mrf.mxu1  ;;  %v3667_v33 = vmax.f32 %v3631_v5, 0.0 }
 0x1f3   : > { %v3458_v7 = vpop.f32.mrf.mxu0  ;;  %v3277_v0 = vadd.f32 %v3160_v57, %v6323_v42 }
 0x1f4   : > { %4270 = vst [vmem:[%s6413_s6] sm:$0xff] %v4269_v40   ;;  %v3632_v16 = vadd.f32 %v6399_v14, %v3589_v29  ;;  %v3587_v2 = vadd.f32 %v3458_v7, %v3273_v19  ;;  %v4826_v8 = vpop.f32.mrf.mxu1  ;;  %v3665_v63 = vmax.f32 %v3629_v56, 0.0 }
 0x1f5   : > { %v4860_v25 = vpop.f32.mrf.mxu0  ;;  %v3282_v27 = vadd.f32 %v4826_v8, %v6326_v47 }
 0x1f6   : > { %v3668_v58 = vmax.f32 %v3632_v16, 0.0  ;;  %v3630_v31 = vadd.f32 %v6399_v14, %v3587_v2  ;;  %v3592_v37 = vadd.f32 %v4860_v25, %v3278_v60  ;;  %v3173_v18 = vpop.f32.mrf.mxu1 }
 0x1f7   : > { %v3471_v17 = vpop.f32.mrf.mxu0  ;;  %v3280_v29 = vadd.f32 %v3173_v18, %v6329_v11 }
 0x1f8   : > { %v4284_v6 = vpack.c.bf16 %v3668_v58, %v3667_v33  ;;  %v3666_v4 = vmax.f32 %v3630_v31, 0.0  ;;  %v3590_v12 = vadd.f32 %v3471_v17, %v3276_v61  ;;  %v3635_v24 = vadd.f32 %v6399_v14, %v3592_v37  ;;  %v4827_v54 = vpop.f32.mrf.mxu1 }
 0x1f9   : > { %v4861_v22 = vpop.f32.mrf.mxu0  ;;  %v3283_v47 = vadd.f32 %v4827_v54, %v6332_v1 }
 0x1fa   : > { %4358 = vst [vmem:[%s6413_s6 + $0x18] sm:$0xff] %v4284_v6   ;;  %v4279_v51 = vpack.c.bf16 %v3666_v4, %v3665_v63  ;;  %v3593_v55 = vadd.f32 %v4861_v22, %v3279_v46  ;;  %v3633_v45 = vadd.f32 %v6399_v14, %v3590_v12  ;;  %v3176_v34 = vpop.f32.mrf.mxu1  ;;  %v3671_v19 = vmax.f32 %v3635_v24, 0.0 }
 0x1fb   : > { %v3474_v13 = vpop.f32.mrf.mxu0  ;;  %v3281_v33 = vadd.f32 %v3176_v34, %v6335_v50 }
 0x1fc   : > { %4357 = vst [vmem:[%s6413_s6 + $0x10] sm:$0xff] %v4279_v51   ;;  %v3636_v28 = vadd.f32 %v6399_v14, %v3593_v55  ;;  %v3591_v30 = vadd.f32 %v3474_v13, %v3277_v0  ;;  %v4830_v21 = vpop.f32.mrf.mxu1  ;;  %v3669_v60 = vmax.f32 %v3633_v45, 0.0 }
 0x1fd   : > { %v4864_v62 = vpop.f32.mrf.mxu0  ;;  %v3286_v8 = vadd.f32 %v4830_v21, %v6338_v41 }
 0x1fe   : > { %v3672_v40 = vmax.f32 %v3636_v28, 0.0  ;;  %v3634_v42 = vadd.f32 %v6399_v14, %v3591_v30  ;;  %v3596_v5 = vadd.f32 %v4864_v62, %v3282_v27  ;;  %v3189_v2 = vpop.f32.mrf.mxu1 }
 0x1ff   : > { %v3487_v7 = vpop.f32.mrf.mxu0  ;;  %v3284_v22 = vadd.f32 %v3189_v2, %v6341_v52 }
 0x200   : > { %v4294_v56 = vpack.c.bf16 %v3672_v40, %v3671_v19  ;;  %v3670_v16 = vmax.f32 %v3634_v42, 0.0  ;;  %v3594_v57 = vadd.f32 %v3487_v7, %v3280_v29  ;;  %v3639_v31 = vadd.f32 %v6399_v14, %v3596_v5  ;;  %v4831_v61 = vpop.f32.mrf.mxu1 }
 0x201   : > { %v4865_v25 = vpop.f32.mrf.mxu0  ;;  %v3287_v41 = vadd.f32 %v4831_v61, %v6344_v49 }
 0x202   : > { %4360 = vst [vmem:[%s6413_s6 + $0x28] sm:$0xff] %v4294_v56   ;;  %v4289_v58 = vpack.c.bf16 %v3670_v16, %v3669_v60  ;;  %v3597_v37 = vadd.f32 %v4865_v25, %v3283_v47  ;;  %v3637_v17 = vadd.f32 %v6399_v14, %v3594_v57  ;;  %v3192_v46 = vpop.f32.mrf.mxu1  ;;  %v3675_v4 = vmax.f32 %v3639_v31, 0.0 }
 0x203   : > { %v3490_v11 = vpop.f32.mrf.mxu0  ;;  %v3285_v28 = vadd.f32 %v3192_v46, %v6347_v26 }
 0x204   : > { %4359 = vst [vmem:[%s6413_s6 + $0x20] sm:$0xff] %v4289_v58   ;;  %v3640_v1 = vadd.f32 %v6399_v14, %v3597_v37  ;;  %v3595_v63 = vadd.f32 %v3490_v11, %v3281_v33  ;;  %v4834_v0 = vpop.f32.mrf.mxu1  ;;  %v3673_v24 = vmax.f32 %v3637_v17, 0.0 }
 0x205   : > { %v4868_v6 = vpop.f32.mrf.mxu0  ;;  %v3290_v40 = vadd.f32 %v4834_v0, %v6350_v10 }
 0x206   : > { %v3676_v18 = vmax.f32 %v3640_v1, 0.0  ;;  %v3638_v50 = vadd.f32 %v6399_v14, %v3595_v63  ;;  %v3600_v12 = vadd.f32 %v4868_v6, %v3286_v8  ;;  %v3205_v13 = vpop.f32.mrf.mxu1 }
 0x207   : > { %v3503_v51 = vpop.f32.mrf.mxu0  ;;  %v3288_v56 = vadd.f32 %v3205_v13, %v6353_v3 }
 0x208   : > { %v4304_v55 = vpack.c.bf16 %v3676_v18, %v3675_v4  ;;  %v3674_v54 = vmax.f32 %v3638_v50, 0.0  ;;  %v3598_v27 = vadd.f32 %v3503_v51, %v3284_v22  ;;  %v3643_v34 = vadd.f32 %v6399_v14, %v3600_v12  ;;  %v4835_v19 = vpop.f32.mrf.mxu1 }
 0x209   : > { %v4869_v45 = vpop.f32.mrf.mxu0  ;;  %v3291_v10 = vadd.f32 %v4835_v19, %v6356_v43 }
 0x20a   : > { %4362 = vst [vmem:[%s6413_s6 + $0x38] sm:$0xff] %v4304_v55   ;;  %v4299_v30 = vpack.c.bf16 %v3674_v54, %v3673_v24  ;;  %v3601_v62 = vadd.f32 %v4869_v45, %v3287_v41  ;;  %v3641_v42 = vadd.f32 %v6399_v14, %v3598_v27  ;;  %v3208_v29 = vpop.f32.mrf.mxu1  ;;  %v3679_v7 = vmax.f32 %v3643_v34, 0.0 }
 0x20b   : > { %v3506_v52 = vpop.f32.mrf.mxu0  ;;  %v3289_v61 = vadd.f32 %v3208_v29, %v6359_v32 }
 0x20c   : > { %4361 = vst [vmem:[%s6413_s6 + $0x30] sm:$0xff] %v4299_v30   ;;  %v3644_v49 = vadd.f32 %v6399_v14, %v3601_v62  ;;  %v3599_v5 = vadd.f32 %v3506_v52, %v3285_v28  ;;  %v4838_v16 = vpop.f32.mrf.mxu1  ;;  %v3677_v57 = vmax.f32 %v3641_v42, 0.0 }
 0x20d   : > { %v4872_v21 = vpop.f32.mrf.mxu0  ;;  %v3294_v63 = vadd.f32 %v4838_v16, %v6362_v9 }
 0x20e   : > { %v3680_v60 = vmax.f32 %v3644_v49, 0.0  ;;  %v3642_v26 = vadd.f32 %v6399_v14, %v3599_v5  ;;  %v3604_v47 = vadd.f32 %v4872_v21, %v3290_v40  ;;  %v3221_v58 = vpop.f32.mrf.mxu1 }
 0x20f   : > { %v3519_v2 = vpop.f32.mrf.mxu0  ;;  %v3292_v0 = vadd.f32 %v3221_v58, %v6365_v38 }
 0x210   : > { %v4314_v25 = vpack.c.bf16 %v3680_v60, %v3679_v7  ;;  %v3678_v33 = vmax.f32 %v3642_v26, 0.0  ;;  %v3602_v31 = vadd.f32 %v3519_v2, %v3288_v56  ;;  %v3647_v8 = vadd.f32 %v6399_v14, %v3604_v47  ;;  %v4839_v1 = vpop.f32.mrf.mxu1 }
 0x211   : > { %v4873_v37 = vpop.f32.mrf.mxu0  ;;  %v3295_v9 = vadd.f32 %v4839_v1, %v6368_v23 }
 0x212   : > { %4364 = vst [vmem:[%s6413_s6 + $0x48] sm:$0xff] %v4314_v25   ;;  %v4309_v11 = vpack.c.bf16 %v3678_v33, %v3677_v57  ;;  %v3605_v17 = vadd.f32 %v4873_v37, %v3291_v10  ;;  %v3645_v46 = vadd.f32 %v6399_v14, %v3602_v31  ;;  %v3224_v4 = vpop.f32.mrf.mxu1  ;;  %v3683_v50 = vmax.f32 %v3647_v8, 0.0 }
 0x213   : > { %v3522_v3 = vpop.f32.mrf.mxu0  ;;  %v3293_v28 = vadd.f32 %v3224_v4, %v6371_v53 }
 0x214   : > { %4363 = vst [vmem:[%s6413_s6 + $0x40] sm:$0xff] %v4309_v11   ;;  %v3648_v43 = vadd.f32 %v6399_v14, %v3605_v17  ;;  %v3603_v6 = vadd.f32 %v3522_v3, %v3289_v61  ;;  %v4842_v51 = vpop.f32.mrf.mxu1  ;;  %v3681_v41 = vmax.f32 %v3645_v46, 0.0 }
 0x215   : > { %v4876_v18 = vpop.f32.mrf.mxu0  ;;  %v3298_v52 = vadd.f32 %v4842_v51, %v6374_v36 }
 0x216   : > { %v3684_v12 = vmax.f32 %v3648_v43, 0.0  ;;  %v3646_v32 = vadd.f32 %v6399_v14, %v3603_v6  ;;  %v3608_v22 = vadd.f32 %v4876_v18, %v3294_v63  ;;  %v3237_v13 = vpop.f32.mrf.mxu1 }
 0x217   : > { %v3535_v24 = vpop.f32.mrf.mxu0  ;;  %v3296_v60 = vadd.f32 %v3237_v13, %v6377_v35 }
 0x218   : > { %v4324_v55 = vpack.c.bf16 %v3684_v12, %v3683_v50  ;;  %v3682_v54 = vmax.f32 %v3646_v32, 0.0  ;;  %v3606_v27 = vadd.f32 %v3535_v24, %v3292_v0  ;;  %v3651_v34 = vadd.f32 %v6399_v14, %v3608_v22  ;;  %v4843_v19 = vpop.f32.mrf.mxu1 }
 0x219   : > { %v4877_v45 = vpop.f32.mrf.mxu0  ;;  %v3299_v36 = vadd.f32 %v4843_v19, %v6380_v44 }
 0x21a   : > { %4366 = vst [vmem:[%s6413_s6 + $0x58] sm:$0xff] %v4324_v55   ;;  %v4319_v30 = vpack.c.bf16 %v3682_v54, %v3681_v41  ;;  %v3609_v62 = vadd.f32 %v4877_v45, %v3295_v9  ;;  %v3649_v40 = vadd.f32 %v6399_v14, %v3606_v27  ;;  %v3240_v49 = vpop.f32.mrf.mxu1  ;;  %v3687_v29 = vmax.f32 %v3651_v34, 0.0 }
 0x21b   : > { %v3538_v38 = vpop.f32.mrf.mxu0  ;;  %v3297_v58 = vadd.f32 %v3240_v49, %v6383_v15 }
 0x21c   : > { %4365 = vst [vmem:[%s6413_s6 + $0x50] sm:$0xff] %v4319_v30   ;;  %v3652_v23 = vadd.f32 %v6399_v14, %v3609_v62  ;;  %v3607_v42 = vadd.f32 %v3538_v38, %v3293_v28  ;;  %v4846_v26 = vpop.f32.mrf.mxu1  ;;  %v3685_v56 = vmax.f32 %v3649_v40, 0.0 }
 0x21d   : > { %v4880_v5 = vpop.f32.mrf.mxu0  ;;  %v3302_v11 = vadd.f32 %v4846_v26, %v6386_v20 }
 0x21e   : > { %v3688_v21 = vmax.f32 %v3652_v23, 0.0  ;;  %v3650_v53 = vadd.f32 %v6399_v14, %v3607_v42  ;;  %v3612_v7 = vadd.f32 %v4880_v5, %v3298_v52  ;;  %v3253_v10 = vpop.f32.mrf.mxu1 }
 0x21f   : > { %v3551_v47 = vpop.f32.mrf.mxu0  ;;  %v3300_v63 = vadd.f32 %v3253_v10, %v6388_v39 }
 0x220   : > { %v4334_v16 = vpack.c.bf16 %v3688_v21, %v3687_v29  ;;  %v3686_v2 = vmax.f32 %v3650_v53, 0.0  ;;  %v3655_v57 = vadd.f32 %v6399_v14, %v3612_v7  ;;  %v3610_v25 = vadd.f32 %v3551_v47, %v3296_v60  ;;  %v4847_v61 = vpop.f32.mrf.mxu1 }
 0x221   : > { %v4881_v33 = vpop.f32.mrf.mxu0  ;;  %v3303_v6 = vadd.f32 %v4847_v61, %v6390_v59 }
 0x222   : > { %4368 = vst [vmem:[%s6413_s6 + $0x68] sm:$0xff] %v4334_v16   ;;  %v4329_v31 = vpack.c.bf16 %v3686_v2, %v3685_v56  ;;  %v3613_v37 = vadd.f32 %v4881_v33, %v3299_v36  ;;  %v3653_v8 = vadd.f32 %v6399_v14, %v3610_v25  ;;  %v3691_v1 = vmax.f32 %v3655_v57, 0.0  ;;  %v3256_v4 = vpop.f32.mrf.mxu1 }
 0x223   : > { %v3554_v35 = vpop.f32.mrf.mxu0  ;;  %v3301_v0 = vadd.f32 %v3256_v4, %v6393_v48 }
 0x224   : > { %4367 = vst [vmem:[%s6413_s6 + $0x60] sm:$0xff] %v4329_v31   ;;  %v3656_v44 = vadd.f32 %v6399_v14, %v3613_v37  ;;  %v3611_v17 = vadd.f32 %v3554_v35, %v3297_v58  ;;  %v3689_v20 = vmax.f32 %v3653_v8, 0.0 }
 0x225   : > { %v4884_v3 = vpop.f32.mrf.mxu0 }
 0x226   : > { %v3692_v46 = vmax.f32 %v3656_v44, 0.0  ;;  %v3654_v15 = vadd.f32 %v6399_v14, %v3611_v17  ;;  %v3616_v43 = vadd.f32 %v4884_v3, %v3302_v11 }
 0x227   : > { %v3567_v18 = vpop.f32.mrf.mxu0 }
 0x228   : > { %v4344_v50 = vpack.c.bf16 %v3692_v46, %v3691_v1  ;;  %v3690_v12 = vmax.f32 %v3654_v15, 0.0  ;;  %v3614_v32 = vadd.f32 %v3567_v18, %v3300_v63  ;;  %v3659_v51 = vadd.f32 %v6399_v14, %v3616_v43 }
 0x229   : > { %v4885_v22 = vpop.f32.mrf.mxu0 }
 0x22a   : > { %4370 = vst [vmem:[%s6413_s6 + $0x78] sm:$0xff] %v4344_v50   ;;  %v4339_v39 = vpack.c.bf16 %v3690_v12, %v3689_v20  ;;  %v3617_v24 = vadd.f32 %v4885_v22, %v3303_v6  ;;  %v3657_v59 = vadd.f32 %v6399_v14, %v3614_v32  ;;  %v3695_v54 = vmax.f32 %v3659_v51, 0.0 }
 0x22b   : > { %v3570_v41 = vpop.f32.mrf.mxu0 }
 0x22c   : > { %4369 = vst [vmem:[%s6413_s6 + $0x70] sm:$0xff] %v4339_v39   ;;  %v3660_v9 = vadd.f32 %v6399_v14, %v3617_v24  ;;  %v3615_v55 = vadd.f32 %v3570_v41, %v3301_v0  ;;  %v3693_v48 = vmax.f32 %v3657_v59, 0.0 }
 0x22e   : > { %v3696_v13 = vmax.f32 %v3660_v9, 0.0  ;;  %v3658_v27 = vadd.f32 %v6399_v14, %v3615_v55 }
 0x230   : > { %v4354_v45 = vpack.c.bf16 %v3696_v13, %v3695_v54  ;;  %v3694_v28 = vmax.f32 %v3658_v27, 0.0 }
 0x232   : > { %4372 = vst [vmem:[%s6413_s6 + $0x88] sm:$0xff] %v4354_v45   ;;  %v4349_v30 = vpack.c.bf16 %v3694_v28, %v3693_v48 }
 0x234   : > { %4371 = vst [vmem:[%s6413_s6 + $0x80] sm:$0xff] %v4349_v30  }
 0x235   : > { %5017 = shalt.err (!%p5014_p3)
}
 0x236   : > { %s5018_s25 = scalar_lea.hbm %s6500_s11, 2304  ;;  %s5022_s28 = scalar_lea.hbm %s6548_s3, 4608 }
 0x237   : > { %p5019_p4 = scmp.ne.s32.totalorder %s6500_s11, %s5018_s25  ;;  %p5023_p9 = scmp.lt.s32.totalorder %s6500_s11, %s6548_s3 }
 0x238   : > { %p5024_p10 = scmp.lt.s32.totalorder %s5022_s28, %s5018_s25 }
 0x239   : > { %p5020_p7 = pnand %p5019_p4, %p5127_p5 }
 0x23a   : > { %p5025_p11 = por %p5024_p10, %p5023_p9 }
 0x23b   : > { %p5021_p8 = pneg %p5020_p7 }
 0x23d   : > { %p5026_p12 = pnand %p5025_p11, %p5021_p8 }
 0x23f   : > { %5029 = shalt.err (!%p5026_p12)
}
 0x240   : > { %s5067_s4 = smov 64   ;;  %s5068_s5 = smov 4  }
 0x241   : > { %4901 = dma.vmem_to_hbm [thread:$0]  (%p5127_p5), %s6494_s8, 2304, %s6500_s11, %s6505_s17, %s5067_s4, %s5067_s4, %s5068_s5  }
 0x242 PF: > { %p4907_p13 = scmp.ge.s32.totalorder %s5064_s15, 2  ;;  %s3906_s6 = sand.u32 1, %s5052_s12  }
 0x243   : > { %s3907_s7 = scalar_lea.sflag [#allocation3], %s3906_s6 }
 0x244   : > { %p4904_p0 = pnand %p4907_p13, %p5131_p6 }
 0x246   : > { %p4905_p1 = pneg %p4904_p0 }
 0x248   : > { %5047 = dma.done.wait (%p4905_p1), %s3907_s7, 2304  }
 0x249   : > { %5049 = vsyncadd (%p4905_p1), %s3907_s7, 4294964992  ;;  %p13_p2 = scmp.ge.s32.totalorder %s5114_s18, 4   ;;  %s6589_s12 = smov %s5056_s13 }
 0x24a   : > { %s6590_s13 = smov %s5060_s14  ;;  %s6591_s14 = smov %s5125_s21 }
 0x24b   : > { %s6592_s15 = smov %s5114_s18  ;;  %15 = sbr.rel (!%p13_p2) target bundleno = 3 (0x3), region = 75 }
 0x250   :  { %3912 = vsyncpa [#allocation3], 1 }
 0x251   :  { %3914 = vsyncpa [#allocation3 + $0x1], 1 }

</bundles_post_ra>
